<compile_context>
chip_gen: v6e
topology: v6e:2x2x1
jax: 0.10.0
libtpu: 0.0.40
codegen_flags: <defaults>
</compile_context>

<pallas_src>
import functools

import numpy as np
import jax
import jax.numpy as jnp
from jax.experimental import pallas as pl
from jax.experimental.pallas import tpu as pltpu

EMBED_DIM = 32            # small synthetic embed_dim (module default is 768)
SPEAKER_DIM = 20
G_DIM = 3 * EMBED_DIM     # span representation width (rows of g_i)
HIDDEN = 150              # Score() logical hidden_dim
HIDDEN_PAD = 256          # zero-padded hidden dim (MXU / lane aligned; exact equivalence)
PAIR_TILE = 256           # pairs processed per grid step (fills MXU M dimension)


def _coref_score_kernel(ig_ref, jg_ref, phi_ref, base_ref,
                        w1i_ref, w1j_ref, w1p_ref, w1s_ref, b1_ref,
                        w2_ref, b2_ref, w3_ref, out_ref):
    ig = ig_ref[...]                      # (T, G_DIM)  bf16
    jg = jg_ref[...]                      # (T, G_DIM)  bf16
    # Layer 1: pairs = cat(i_g, j_g, i_g*j_g, phi) @ W1 + b1, with W1 split by row
    # blocks so the concat never materializes.  bf16 MXU inputs, f32 accumulation.
    h = jnp.dot(ig, w1i_ref[...], preferred_element_type=jnp.float32)
    h = h + jnp.dot(jg, w1j_ref[...], preferred_element_type=jnp.float32)
    h = h + jnp.dot(ig * jg, w1p_ref[...], preferred_element_type=jnp.float32)
    h = h + jnp.dot(phi_ref[...], w1s_ref[...], preferred_element_type=jnp.float32)
    h1 = jnp.maximum(h + b1_ref[...], 0.0)                          # (T, H) f32, Linear1+ReLU

    # Layer 2
    h2 = jnp.dot(h1.astype(jnp.bfloat16), w2_ref[...],
                 preferred_element_type=jnp.float32) + b2_ref[...]
    h2 = jnp.maximum(h2, 0.0)                                       # (T, H) f32, Linear2+ReLU

    # Layer 3 (output width 1): keep it off the MXU.  One well-tiled XLU transpose of
    # h2, then a VPU multiply + sublane reduction gives the lane-dense (1, T) row.
    s_ij = jnp.sum(h2.T * w3_ref[...], axis=0, keepdims=True)       # (1, T) f32

    # coref_scores = s_i + s_j + s_ij   (base = s_i + s_j + b3, precomputed lane-dense)
    out_ref[...] = base_ref[...] + s_ij


def _pad_rows(x, p_pad):
    return jnp.pad(x, ((0, p_pad - x.shape[0]), (0, 0)))


def coref_scores_pallas(i_g, j_g, phi, s_i, s_j, params):
    """Returns coref_scores [P, 1] (float32)."""
    w1i, w1j, w1p, w1s, b1, w2, b2, w3, b3 = params
    P = i_g.shape[0]
    num_tiles = pl.cdiv(P, PAIR_TILE)
    P_pad = num_tiles * PAIR_TILE
    bf = jnp.bfloat16

    # Pair features: row-pad, cast to bf16 for the MXU.
    ig = _pad_rows(i_g.astype(bf), P_pad)
    jg = _pad_rows(j_g.astype(bf), P_pad)
    ph = _pad_rows(phi.astype(bf), P_pad)
    # s_i + s_j (+ b3 folded in) as a lane-dense (num_tiles, PAIR_TILE) slab.
    base = _pad_rows((s_i + s_j + b3[0, 0]).astype(jnp.float32), P_pad)
    base = base.reshape(num_tiles, PAIR_TILE)

    # Zero-pad the hidden dim 150 -> 256 (exactly equivalent: padded columns stay 0
    # through the ReLUs and the padded rows of w2/w3 are zero).
    hp = HIDDEN_PAD - HIDDEN
    padh = lambda w: jnp.pad(w, ((0, 0), (0, hp)))
    w1i_b = padh(w1i).astype(bf)
    w1j_b = padh(w1j).astype(bf)
    w1p_b = padh(w1p).astype(bf)
    w1s_b = padh(w1s).astype(bf)
    b1_p = padh(b1).astype(jnp.float32)
    w2_b = jnp.pad(w2, ((0, hp), (0, hp))).astype(bf)
    b2_p = padh(b2).astype(jnp.float32)
    w3_p = jnp.pad(w3, ((0, hp), (0, 0))).astype(jnp.float32)       # (HIDDEN_PAD, 1)

    def pair_spec(d):
        return pl.BlockSpec((PAIR_TILE, d), lambda i: (i, 0))

    def full_spec(shape):
        # Constant index map -> the pipeline keeps these resident (no re-DMA per step).
        return pl.BlockSpec(shape, lambda i: (0, 0))

    out = pl.pallas_call(
        _coref_score_kernel,
        out_shape=jax.ShapeDtypeStruct((num_tiles, PAIR_TILE), jnp.float32),
        grid_spec=pltpu.PrefetchScalarGridSpec(
            num_scalar_prefetch=0,
            grid=(num_tiles,),
            in_specs=[
                pair_spec(G_DIM), pair_spec(G_DIM), pair_spec(SPEAKER_DIM),
                pl.BlockSpec((1, PAIR_TILE), lambda i: (i, 0)),      # base (lane-dense)
                full_spec((G_DIM, HIDDEN_PAD)), full_spec((G_DIM, HIDDEN_PAD)),
                full_spec((G_DIM, HIDDEN_PAD)), full_spec((SPEAKER_DIM, HIDDEN_PAD)),
                full_spec((1, HIDDEN_PAD)),
                full_spec((HIDDEN_PAD, HIDDEN_PAD)), full_spec((1, HIDDEN_PAD)),
                full_spec((HIDDEN_PAD, 1)),
            ],
            out_specs=pl.BlockSpec((1, PAIR_TILE), lambda i: (i, 0)),
        ),
        # Pair tiles are fully independent -> sharded across both v7x TensorCores;
        # harmless no-op on v5e/v6e.
        compiler_params=pltpu.CompilerParams(dimension_semantics=("parallel",)),
    )(ig, jg, ph, base, w1i_b, w1j_b, w1p_b, w1s_b, b1_p, w2_b, b2_p, w3_p)
    return out.reshape(P_pad, 1)[:P]


def coref_scores_ref(i_g, j_g, phi, s_i, s_j, params):
    """Pure-JAX f32 reference of the module math."""
    w1i, w1j, w1p, w1s, b1, w2, b2, w3, b3 = params
    pairs = jnp.concatenate([i_g, j_g, i_g * j_g, phi], axis=1)
    w1 = jnp.concatenate([w1i, w1j, w1p, w1s], axis=0)
    h = jax.nn.relu(pairs @ w1 + b1)
    h = jax.nn.relu(h @ w2 + b2)
    return s_i + s_j + h @ w3 + b3


def coref_scores_bf16_ref(i_g, j_g, phi, s_i, s_j, params):
    """Reference matching the kernel's bf16-input / f32-accumulate matmuls."""
    w1i, w1j, w1p, w1s, b1, w2, b2, w3, b3 = params
    bf = jnp.bfloat16
    dot = functools.partial(jnp.dot, preferred_element_type=jnp.float32)
    ig, jg, ph = i_g.astype(bf), j_g.astype(bf), phi.astype(bf)
    h = (dot(ig, w1i.astype(bf)) + dot(jg, w1j.astype(bf))
         + dot(ig * jg, w1p.astype(bf)) + dot(ph, w1s.astype(bf)))
    h1 = jax.nn.relu(h + b1)
    h2 = jax.nn.relu(dot(h1.astype(bf), w2.astype(bf)) + b2)
    return s_i + s_j + h2 @ w3 + b3


def mention_link_scorer_forward(mention_ids, antecedent_ids, speaker_labels,
                                antecedent_counts, g_i, mention_scores,
                                speaker_table, score_params):
    # index_select glue (plain JAX)
    s_i = mention_scores[mention_ids]
    s_j = mention_scores[antecedent_ids]
    i_g = g_i[mention_ids]
    j_g = g_i[antecedent_ids]
    phi = speaker_table[speaker_labels]          # Embedding(3, speaker_dim, padding_idx=0)

    coref_scores = coref_scores_pallas(i_g, j_g, phi, s_i, s_j, score_params)

    # Vectorized per-group softmax-with-epsilon (segment softmax) instead of a Python
    # loop of tiny per-group softmaxes; the trailing split is just output formatting.
    counts = np.asarray(antecedent_counts, dtype=np.int32)
    G = len(counts)
    P = int(counts.sum())
    seg_ids = jnp.concatenate([
        jnp.asarray(np.repeat(np.arange(G, dtype=np.int32), counts)),
        jnp.arange(G, dtype=jnp.int32),                      # one epsilon row per group
    ])
    vals = jnp.concatenate([coref_scores[:, 0], jnp.zeros((G,), jnp.float32)])
    seg_max = jax.ops.segment_max(vals, seg_ids, num_segments=G)
    ex = jnp.exp(vals - seg_max[seg_ids])
    denom = jax.ops.segment_sum(ex, seg_ids, num_segments=G)
    probs = ex / denom[seg_ids]
    score_probs, eps_probs = probs[:P], probs[P:]

    # Re-assemble the module's ragged output.  The leading "empty" group is softmax of
    # the lone epsilon => [[1.0]].
    with_epsilon_probs = [jnp.ones((1, 1), jnp.float32)]
    start = 0
    for g, c in enumerate(counts):
        grp = jnp.concatenate([score_probs[start:start + int(c)], eps_probs[g:g + 1]])
        with_epsilon_probs.append(grp[:, None])
        start += int(c)
    return coref_scores, with_epsilon_probs


def init_params(key):
    ks = jax.random.split(key, 8)
    scale = 0.02
    w1i = scale * jax.random.normal(ks[0], (G_DIM, HIDDEN), jnp.float32)
    w1j = scale * jax.random.normal(ks[1], (G_DIM, HIDDEN), jnp.float32)
    w1p = scale * jax.random.normal(ks[2], (G_DIM, HIDDEN), jnp.float32)
    w1s = scale * jax.random.normal(ks[3], (SPEAKER_DIM, HIDDEN), jnp.float32)
    b1 = jnp.zeros((1, HIDDEN), jnp.float32)
    w2 = scale * jax.random.normal(ks[4], (HIDDEN, HIDDEN), jnp.float32)
    b2 = jnp.zeros((1, HIDDEN), jnp.float32)
    w3 = scale * jax.random.normal(ks[5], (HIDDEN, 1), jnp.float32)
    b3 = jnp.zeros((1, 1), jnp.float32)
    # Speaker embedding table: Embedding(3, speaker_dim, padding_idx=0) -> row 0 is zeros
    speaker_table = scale * jax.random.normal(ks[6], (3, SPEAKER_DIM), jnp.float32)
    speaker_table = speaker_table.at[0].set(0.0)
    return (w1i, w1j, w1p, w1s, b1, w2, b2, w3, b3), speaker_table


if __name__ == "__main__":
    key = jax.random.PRNGKey(0)
    k_par, k_g, k_ms = jax.random.split(key, 3)
    score_params, speaker_table = init_params(k_par)

    # Synthetic spans: M mentions; mention i's antecedents yi are the previous
    # min(i, MAX_ANT) mentions.  Speaker of mention m is (m % 3); speaker_label is
    # 1 if same speaker else 2 (0 is the padding / "unknown" label).
    M, MAX_ANT = 12, 4
    mention_ids_l, antecedent_ids_l, speaker_labels_l, antecedent_counts = [], [], [], []
    for i in range(M):
        yi = list(range(max(0, i - MAX_ANT), i))
        if yi:
            antecedent_counts.append(len(yi))
        for j in yi:
            mention_ids_l.append(i)
            antecedent_ids_l.append(j)
            speaker_labels_l.append(1 if (i % 3) == (j % 3) else 2)

    mention_ids = jnp.array(mention_ids_l, dtype=jnp.int32)
    antecedent_ids = jnp.array(antecedent_ids_l, dtype=jnp.int32)
    speaker_labels = jnp.array(speaker_labels_l, dtype=jnp.int32)

    g_i = jax.random.normal(k_g, (M, G_DIM), jnp.float32)          # span representations
    mention_scores = jax.random.normal(k_ms, (M, 1), jnp.float32)  # s_m(i)

    coref_scores, with_epsilon_probs = mention_link_scorer_forward(
        mention_ids, antecedent_ids, speaker_labels, antecedent_counts,
        g_i, mention_scores, speaker_table, score_params)
    jax.block_until_ready(coref_scores)
    for p in with_epsilon_probs:
        jax.block_until_ready(p)

    # Correctness checks.
    s_i = mention_scores[mention_ids]
    s_j = mention_scores[antecedent_ids]
    i_g = g_i[mention_ids]
    j_g = g_i[antecedent_ids]
    phi = speaker_table[speaker_labels]
    ref_bf16 = coref_scores_bf16_ref(i_g, j_g, phi, s_i, s_j, score_params)
    ref_f32 = coref_scores_ref(i_g, j_g, phi, s_i, s_j, score_params)
    assert jnp.allclose(coref_scores, ref_bf16, atol=5e-3, rtol=5e-3), \
        "mismatch vs bf16-emulating reference"
    assert jnp.allclose(coref_scores, ref_f32, atol=2e-2, rtol=2e-2), \
        "mismatch vs f32 reference (beyond bf16 tolerance)"
    # per-group probs each sum to 1
    for p in with_epsilon_probs:
        assert abs(float(jnp.sum(p)) - 1.0) < 1e-5

    print("KERNEL_OK")
</pallas_src>

<mosaic_0001>
module attributes {stable_mosaic.version = 11 : i64} {
  func.func @_coref_score_kernel(%arg0: i32, %arg1: memref<256x96xbf16, #tpu.memory_space<vmem>>, %arg2: memref<256x96xbf16, #tpu.memory_space<vmem>>, %arg3: memref<256x20xbf16, #tpu.memory_space<vmem>>, %arg4: memref<1x256xf32, #tpu.memory_space<vmem>>, %arg5: memref<96x256xbf16, #tpu.memory_space<vmem>>, %arg6: memref<96x256xbf16, #tpu.memory_space<vmem>>, %arg7: memref<96x256xbf16, #tpu.memory_space<vmem>>, %arg8: memref<20x256xbf16, #tpu.memory_space<vmem>>, %arg9: memref<1x256xf32, #tpu.memory_space<vmem>>, %arg10: memref<256x256xbf16, #tpu.memory_space<vmem>>, %arg11: memref<1x256xf32, #tpu.memory_space<vmem>>, %arg12: memref<256x1xf32, #tpu.memory_space<vmem>>, %arg13: memref<1x256xf32, #tpu.memory_space<vmem>>) attributes {dimension_semantics = [#tpu.dimension_semantics<parallel>], iteration_bounds = array<i64: 1>, scalar_prefetch = 0 : i64, scratch_operands = 0 : i64, tpu.core_type = #tpu.core_type<tc>, window_params = [{transform_indices = @transform_0, window_bounds = array<i64: 256, 96>}, {transform_indices = @transform_1, window_bounds = array<i64: 256, 96>}, {transform_indices = @transform_2, window_bounds = array<i64: 256, 20>}, {transform_indices = @transform_3, window_bounds = array<i64: 1, 256>}, {pipeline_mode = #tpu.pipeline_mode<synchronous>, transform_indices = @transform_4, window_bounds = array<i64: 96, 256>}, {pipeline_mode = #tpu.pipeline_mode<synchronous>, transform_indices = @transform_5, window_bounds = array<i64: 96, 256>}, {pipeline_mode = #tpu.pipeline_mode<synchronous>, transform_indices = @transform_6, window_bounds = array<i64: 96, 256>}, {pipeline_mode = #tpu.pipeline_mode<synchronous>, transform_indices = @transform_7, window_bounds = array<i64: 20, 256>}, {pipeline_mode = #tpu.pipeline_mode<synchronous>, transform_indices = @transform_8, window_bounds = array<i64: 1, 256>}, {pipeline_mode = #tpu.pipeline_mode<synchronous>, transform_indices = @transform_9, window_bounds = array<i64: 256, 256>}, {pipeline_mode = #tpu.pipeline_mode<synchronous>, transform_indices = @transform_10, window_bounds = array<i64: 1, 256>}, {pipeline_mode = #tpu.pipeline_mode<synchronous>, transform_indices = @transform_11, window_bounds = array<i64: 256, 1>}, {transform_indices = @transform_12, window_bounds = array<i64: 1, 256>}]} {
    %c0 = arith.constant 0 : index
    %c0_0 = arith.constant 0 : index
    %0 = vector.load %arg1[%c0, %c0_0] : memref<256x96xbf16, #tpu.memory_space<vmem>>, vector<256x96xbf16>
    %c0_1 = arith.constant 0 : index
    %c0_2 = arith.constant 0 : index
    %1 = vector.load %arg2[%c0_1, %c0_2] : memref<256x96xbf16, #tpu.memory_space<vmem>>, vector<256x96xbf16>
    %c0_3 = arith.constant 0 : index
    %c0_4 = arith.constant 0 : index
    %2 = vector.load %arg5[%c0_3, %c0_4] : memref<96x256xbf16, #tpu.memory_space<vmem>>, vector<96x256xbf16>
    %cst = arith.constant dense<0.000000e+00> : vector<256x256xf32>
    %3 = tpu.matmul %0, %2, %cst {dimension_numbers = #tpu.dot_dimension_numbers<[1], [0], [0], [1], [0, 0, 1, 1], [], []>} : vector<256x96xbf16>, vector<96x256xbf16>, vector<256x256xf32> -> vector<256x256xf32>
    %c0_5 = arith.constant 0 : index
    %c0_6 = arith.constant 0 : index
    %4 = vector.load %arg6[%c0_5, %c0_6] : memref<96x256xbf16, #tpu.memory_space<vmem>>, vector<96x256xbf16>
    %cst_7 = arith.constant dense<0.000000e+00> : vector<256x256xf32>
    %5 = tpu.matmul %1, %4, %cst_7 {dimension_numbers = #tpu.dot_dimension_numbers<[1], [0], [0], [1], [0, 0, 1, 1], [], []>} : vector<256x96xbf16>, vector<96x256xbf16>, vector<256x256xf32> -> vector<256x256xf32>
    %6 = arith.addf %3, %5 : vector<256x256xf32>
    %7 = arith.mulf %0, %1 : vector<256x96xbf16>
    %c0_8 = arith.constant 0 : index
    %c0_9 = arith.constant 0 : index
    %8 = vector.load %arg7[%c0_8, %c0_9] : memref<96x256xbf16, #tpu.memory_space<vmem>>, vector<96x256xbf16>
    %cst_10 = arith.constant dense<0.000000e+00> : vector<256x256xf32>
    %9 = tpu.matmul %7, %8, %cst_10 {dimension_numbers = #tpu.dot_dimension_numbers<[1], [0], [0], [1], [0, 0, 1, 1], [], []>} : vector<256x96xbf16>, vector<96x256xbf16>, vector<256x256xf32> -> vector<256x256xf32>
    %10 = arith.addf %6, %9 : vector<256x256xf32>
    %c0_11 = arith.constant 0 : index
    %c0_12 = arith.constant 0 : index
    %11 = vector.load %arg3[%c0_11, %c0_12] : memref<256x20xbf16, #tpu.memory_space<vmem>>, vector<256x20xbf16>
    %c0_13 = arith.constant 0 : index
    %c0_14 = arith.constant 0 : index
    %12 = vector.load %arg8[%c0_13, %c0_14] : memref<20x256xbf16, #tpu.memory_space<vmem>>, vector<20x256xbf16>
    %cst_15 = arith.constant dense<0.000000e+00> : vector<256x256xf32>
    %13 = tpu.matmul %11, %12, %cst_15 {dimension_numbers = #tpu.dot_dimension_numbers<[1], [0], [0], [1], [0, 0, 1, 1], [], []>} : vector<256x20xbf16>, vector<20x256xbf16>, vector<256x256xf32> -> vector<256x256xf32>
    %14 = arith.addf %10, %13 : vector<256x256xf32>
    %c0_16 = arith.constant 0 : index
    %c0_17 = arith.constant 0 : index
    %15 = vector.load %arg9[%c0_16, %c0_17] : memref<1x256xf32, #tpu.memory_space<vmem>>, vector<1x256xf32>
    %16 = vector.broadcast %15 : vector<1x256xf32> to vector<256x256xf32>
    %17 = arith.addf %14, %16 : vector<256x256xf32>
    %cst_18 = arith.constant 0.000000e+00 : f32
    %18 = vector.broadcast %cst_18 : f32 to vector<256x256xf32>
    %19 = arith.maximumf %17, %18 : vector<256x256xf32>
    %20 = arith.truncf %19 : vector<256x256xf32> to vector<256x256xbf16>
    %c0_19 = arith.constant 0 : index
    %c0_20 = arith.constant 0 : index
    %21 = vector.load %arg10[%c0_19, %c0_20] : memref<256x256xbf16, #tpu.memory_space<vmem>>, vector<256x256xbf16>
    %cst_21 = arith.constant dense<0.000000e+00> : vector<256x256xf32>
    %22 = tpu.matmul %20, %21, %cst_21 {dimension_numbers = #tpu.dot_dimension_numbers<[1], [0], [0], [1], [0, 0, 1, 1], [], []>} : vector<256x256xbf16>, vector<256x256xbf16>, vector<256x256xf32> -> vector<256x256xf32>
    %c0_22 = arith.constant 0 : index
    %c0_23 = arith.constant 0 : index
    %23 = vector.load %arg11[%c0_22, %c0_23] : memref<1x256xf32, #tpu.memory_space<vmem>>, vector<1x256xf32>
    %24 = vector.broadcast %23 : vector<1x256xf32> to vector<256x256xf32>
    %25 = arith.addf %22, %24 : vector<256x256xf32>
    %cst_24 = arith.constant 0.000000e+00 : f32
    %26 = vector.broadcast %cst_24 : f32 to vector<256x256xf32>
    %27 = arith.maximumf %25, %26 : vector<256x256xf32>
    %28 = tpu.transpose %27, [1, 0] : vector<256x256xf32> -> vector<256x256xf32>
    %c0_25 = arith.constant 0 : index
    %c0_26 = arith.constant 0 : index
    %29 = vector.load %arg12[%c0_25, %c0_26] : memref<256x1xf32, #tpu.memory_space<vmem>>, vector<256x1xf32>
    %30 = vector.broadcast %29 : vector<256x1xf32> to vector<256x256xf32>
    %31 = arith.mulf %28, %30 : vector<256x256xf32>
    %cst_27 = arith.constant dense<0.000000e+00> : vector<256xf32>
    %32 = vector.multi_reduction <add>, %31, %cst_27 [0] : vector<256x256xf32> to vector<256xf32>
    %33 = vector.shape_cast %32 : vector<256xf32> to vector<1x256xf32>
    %c0_28 = arith.constant 0 : index
    %c0_29 = arith.constant 0 : index
    %34 = vector.load %arg4[%c0_28, %c0_29] : memref<1x256xf32, #tpu.memory_space<vmem>>, vector<1x256xf32>
    %35 = arith.addf %34, %33 : vector<1x256xf32>
    %c0_30 = arith.constant 0 : index
    %c0_31 = arith.constant 0 : index
    %36 = vector.load %arg13[%c0_30, %c0_31] : memref<1x256xf32, #tpu.memory_space<vmem>>, vector<1x256xf32>
    tpu.vector_store %arg13[%c0_30, %c0_31], %35 {strides = array<i32>} : memref<1x256xf32, #tpu.memory_space<vmem>>, vector<1x256xf32>,
    return
  }
  func.func @transform_0(%arg0: i32) -> (i32, i32) {
    %c0_i32 = arith.constant 0 : i32
    %c0_i32_0 = arith.constant 0 : i32
    return %arg0, %c0_i32 : i32, i32
  }
  func.func @transform_1(%arg0: i32) -> (i32, i32) {
    %c0_i32 = arith.constant 0 : i32
    %c0_i32_0 = arith.constant 0 : i32
    return %arg0, %c0_i32 : i32, i32
  }
  func.func @transform_2(%arg0: i32) -> (i32, i32) {
    %c0_i32 = arith.constant 0 : i32
    %c0_i32_0 = arith.constant 0 : i32
    return %arg0, %c0_i32 : i32, i32
  }
  func.func @transform_3(%arg0: i32) -> (i32, i32) {
    %c0_i32 = arith.constant 0 : i32
    %c0_i32_0 = arith.constant 0 : i32
    return %arg0, %c0_i32 : i32, i32
  }
  func.func @transform_4(%arg0: i32) -> (i32, i32) {
    %c0_i32 = arith.constant 0 : i32
    %c0_i32_0 = arith.constant 0 : i32
    %c0_i32_1 = arith.constant 0 : i32
    return %c0_i32, %c0_i32_0 : i32, i32
  }
  func.func @transform_5(%arg0: i32) -> (i32, i32) {
    %c0_i32 = arith.constant 0 : i32
    %c0_i32_0 = arith.constant 0 : i32
    %c0_i32_1 = arith.constant 0 : i32
    return %c0_i32, %c0_i32_0 : i32, i32
  }
  func.func @transform_6(%arg0: i32) -> (i32, i32) {
    %c0_i32 = arith.constant 0 : i32
    %c0_i32_0 = arith.constant 0 : i32
    %c0_i32_1 = arith.constant 0 : i32
    return %c0_i32, %c0_i32_0 : i32, i32
  }
  func.func @transform_7(%arg0: i32) -> (i32, i32) {
    %c0_i32 = arith.constant 0 : i32
    %c0_i32_0 = arith.constant 0 : i32
    %c0_i32_1 = arith.constant 0 : i32
    return %c0_i32, %c0_i32_0 : i32, i32
  }
  func.func @transform_8(%arg0: i32) -> (i32, i32) {
    %c0_i32 = arith.constant 0 : i32
    %c0_i32_0 = arith.constant 0 : i32
    %c0_i32_1 = arith.constant 0 : i32
    return %c0_i32, %c0_i32_0 : i32, i32
  }
  func.func @transform_9(%arg0: i32) -> (i32, i32) {
    %c0_i32 = arith.constant 0 : i32
    %c0_i32_0 = arith.constant 0 : i32
    %c0_i32_1 = arith.constant 0 : i32
    return %c0_i32, %c0_i32_0 : i32, i32
  }
  func.func @transform_10(%arg0: i32) -> (i32, i32) {
    %c0_i32 = arith.constant 0 : i32
    %c0_i32_0 = arith.constant 0 : i32
    %c0_i32_1 = arith.constant 0 : i32
    return %c0_i32, %c0_i32_0 : i32, i32
  }
  func.func @transform_11(%arg0: i32) -> (i32, i32) {
    %c0_i32 = arith.constant 0 : i32
    %c0_i32_0 = arith.constant 0 : i32
    %c0_i32_1 = arith.constant 0 : i32
    return %c0_i32, %c0_i32_0 : i32, i32
  }
  func.func @transform_12(%arg0: i32) -> (i32, i32) {
    %c0_i32 = arith.constant 0 : i32
    %c0_i32_0 = arith.constant 0 : i32
    return %arg0, %c0_i32 : i32, i32
  }
}

</mosaic_0001>

<bundles_post_ra>
// kernel: tpu_custom_call.1
= control target key start
LH: loop header
LB: loop body
LE: loop exit
PB: predicated region body
PF: predicated region fallthrough
CT: control target
= control target key end

     0   :  { %v5160_v2 = vmov 0   ;;  %vm271_vm0 = vcmask 785408   ;;  %vm1562_vm1 = vcmask 1041408   ;;  %s5147_s0 = inlined_call_operand.vmem [shape: bf16[256,96], index: 0, kind: input, shape index: {}]   ;;  %s5148_s1 = inlined_call_operand.vmem [shape: bf16[256,96], index: 1, kind: input, shape index: {}]   ;;  %s5149_s2 = inlined_call_operand.vmem [shape: bf16[256,20], index: 2, kind: input, shape index: {}]   ;;  %s5150_s3 = inlined_call_operand.vmem [shape: f32[1,256], index: 3, kind: input, shape index: {}]   ;;  %s5151_s4 = inlined_call_operand.vmem [shape: bf16[96,256], index: 4, kind: input, shape index: {}]   ;;  %s5152_s5 = inlined_call_operand.vmem [shape: bf16[96,256], index: 5, kind: input, shape index: {}]   ;;  %s5153_s6 = inlined_call_operand.vmem [shape: bf16[96,256], index: 6, kind: input, shape index: {}]   ;;  %s5154_s7 = inlined_call_operand.vmem [shape: bf16[20,256], index: 7, kind: input, shape index: {}]   ;;  %s5155_s8 = inlined_call_operand.vmem [shape: f32[1,256], index: 8, kind: input, shape index: {}]   ;;  %s5156_s9 = inlined_call_operand.vmem [shape: bf16[256,256], index: 9, kind: input, shape index: {}]   ;;  %s5157_s10 = inlined_call_operand.vmem [shape: f32[1,256], index: 10, kind: input, shape index: {}]   ;;  %s5158_s11 = inlined_call_operand.vmem [shape: f32[256,1], index: 11, kind: input, shape index: {}]   ;;  %s5159_s12 = inlined_call_operand.hbm [shape: f32[1,256], index: 12, kind: output, shape index: {}]  }
   0x1   :  { %v3174_v0 = vld [vmem:[%s5152_s5 + $0x54] ss:$8 sps:$4 sm:$0xff]   ;;  %v3176_v1 = vld [vmem:[%s5152_s5 + $0x50] ss:$8 sps:$4 sm:$0xff]   ;;  %432 = vmatprep.mubr.bf16.mxu1 %v5160_v2  ;;  %352 = vmatprep.mubr.bf16.mxu0 %v5160_v2  ;;  %v3177_v3 = vld [vmem:[%s5152_s5 + $0x44] ss:$8 sps:$4 sm:$0xff]  }
   0x2   :  { %3157 = vmatprep.subr.bf16.mxu1 %v3174_v0  ;;  %324 = vmatprep.subr.bf16.mxu0 %v3174_v0  ;;  %v3179_v4 = vld [vmem:[%s5152_s5 + $0x40] ss:$8 sps:$4 sm:$0xff]   ;;  %v3180_v5 = vld [vmem:[%s5152_s5 + $0x34] ss:$8 sps:$4 sm:$0xff]   ;;  %v3182_v6 = vld [vmem:[%s5152_s5 + $0x30] ss:$8 sps:$4 sm:$0xff]  }
   0x3   :  { %3163 = vmatpush1.bf16.msra.mxu1 %v3176_v1  ;;  %325 = vmatpush1.bf16.msra.mxu0 %v3176_v1  ;;  %v3183_v7 = vld [vmem:[%s5152_s5 + $0x24] ss:$8 sps:$4 sm:$0xff]   ;;  %v3185_v8 = vld [vmem:[%s5152_s5 + $0x20] ss:$8 sps:$4 sm:$0xff]   ;;  %v3186_v9 = vld [vmem:[%s5152_s5 + $0x14] ss:$8 sps:$4 sm:$0xff]  }
   0x4   :  { %3158 = vmatprep.subr.bf16.mxu1 %v3177_v3  ;;  %326 = vmatprep.subr.bf16.mxu0 %v3177_v3  ;;  %v3188_v10 = vld [vmem:[%s5152_s5 + $0x10] ss:$8 sps:$4 sm:$0xff]   ;;  %v3189_v11 = vld [vmem:[%s5152_s5 + $0x4] ss:$8 sps:$4 sm:$0xff]   ;;  %v3191_v12 = vld [vmem:[%s5152_s5] ss:$8 sps:$4 sm:$0xff]  }
   0x5   :  { %3173 = vset.pattern.permute.xlu1 %v5160_v2  ;;  %3172 = vset.pattern.permute.xlu0 %v5160_v2  ;;  %v3462_v13 = vld [vmem:[%s5148_s1 + $0x40] sm:$0xf]  ;;  %v3467_v14 = vld [vmem:[%s5148_s1 + $0x44] sm:$0xf]  ;;  %v3195_v17 = vld [vmem:[%s5151_s4 + $0x54] ss:$8 sps:$4 sm:$0xff]  }
   0x6   :  { %v3472_v15 = vld [vmem:[%s5148_s1] sm:$0xf]  ;;  %v3477_v16 = vld [vmem:[%s5148_s1 + $0x4] sm:$0xf]  ;;  %v2964_v18 = vcombine.low %v3462_v13, %v3467_v14  ;;  %v3193_v19 = vld [vmem:[%s5151_s4 + $0x50] ss:$8 sps:$4 sm:$0xff]  }
   0x7   :  { %3164 = vmatpush1.bf16.msra.mxu1 %v3179_v4  ;;  %327 = vmatpush1.bf16.msra.mxu0 %v3179_v4  ;;  %v2956_v20 = vcombine.low %v3472_v15, %v3477_v16  ;;  %v3219_v21 = vld [vmem:[%s5153_s6 + $0x54] ss:$8 sps:$4 sm:$0xff]   ;;  %v3202_v22 = vld [vmem:[%s5151_s4 + $0x44] ss:$8 sps:$4 sm:$0xff]   ;;  %v3498_v23 = vld [vmem:[%s5148_s1 + $0x48] sm:$0xf] }
   0x8   :  { %3159 = vmatprep.subr.bf16.mxu1 %v3180_v5  ;;  %328 = vmatprep.subr.bf16.mxu0 %v3180_v5  ;;  %v3503_v24 = vld [vmem:[%s5148_s1 + $0x4c] sm:$0xf]  ;;  %v3217_v25 = vld [vmem:[%s5153_s6 + $0x50] ss:$8 sps:$4 sm:$0xff]   ;;  %v3513_v26 = vld [vmem:[%s5148_s1 + $0x8] sm:$0xf] }
   0x9   :  { %v3518_v27 = vld [vmem:[%s5148_s1 + $0xc] sm:$0xf]  ;;  %v3200_v29 = vld [vmem:[%s5151_s4 + $0x40] ss:$8 sps:$4 sm:$0xff]   ;;  %v3207_v30 = vld [vmem:[%s5151_s4 + $0x34] ss:$8 sps:$4 sm:$0xff]   ;;  %v2965_v32 = vcombine.low %v3498_v23, %v3503_v24 }
   0xa   :  { %v3225_v28 = vld [vmem:[%s5153_s6 + $0x44] ss:$8 sps:$4 sm:$0xff]   ;;  %v3223_v31 = vld [vmem:[%s5153_s6 + $0x40] ss:$8 sps:$4 sm:$0xff]   ;;  %v2957_v33 = vcombine.low %v3513_v26, %v3518_v27  ;;  %v3205_v34 = vld [vmem:[%s5151_s4 + $0x30] ss:$8 sps:$4 sm:$0xff]  }
   0xb   :  { %3165 = vmatpush1.bf16.msra.mxu1 %v3182_v6  ;;  %329 = vmatpush1.bf16.msra.mxu0 %v3182_v6  ;;  %v3230_v35 = vld [vmem:[%s5153_s6 + $0x34] ss:$8 sps:$4 sm:$0xff]   ;;  %v3547_v36 = vld [vmem:[%s5148_s1 + $0x50] sm:$0xf]  ;;  %v3213_v37 = vld [vmem:[%s5151_s4 + $0x24] ss:$8 sps:$4 sm:$0xff]  }
   0xc   :  { %3160 = vmatprep.subr.bf16.mxu1 %v3183_v7  ;;  %330 = vmatprep.subr.bf16.mxu0 %v3183_v7  ;;  %v3228_v38 = vld [vmem:[%s5153_s6 + $0x30] ss:$8 sps:$4 sm:$0xff]   ;;  %v3236_v39 = vld [vmem:[%s5153_s6 + $0x24] ss:$8 sps:$4 sm:$0xff]   ;;  %v3564_v40 = vld [vmem:[%s5148_s1 + $0x54] sm:$0xf] }
   0xd   :  { %v3570_v41 = vld [vmem:[%s5148_s1 + $0x10] sm:$0xf]  ;;  %v3575_v42 = vld [vmem:[%s5148_s1 + $0x14] sm:$0xf]  ;;  %v3211_v43 = vld [vmem:[%s5151_s4 + $0x20] ss:$8 sps:$4 sm:$0xff]   ;;  %v2966_v46 = vcombine.low %v3547_v36, %v3564_v40 }
   0xe   :  { %v3222_v44 = vld [vmem:[%s5151_s4 + $0x14] ss:$8 sps:$4 sm:$0xff]   ;;  %v3234_v45 = vld [vmem:[%s5153_s6 + $0x20] ss:$8 sps:$4 sm:$0xff]   ;;  %v2958_v47 = vcombine.low %v3570_v41, %v3575_v42  ;;  %v3220_v48 = vld [vmem:[%s5151_s4 + $0x10] ss:$8 sps:$4 sm:$0xff]  }
   0xf   :  { %3166 = vmatpush1.bf16.msra.mxu1 %v3185_v8  ;;  %331 = vmatpush1.bf16.msra.mxu0 %v3185_v8  ;;  %v3233_v49 = vld [vmem:[%s5151_s4 + $0x4] ss:$8 sps:$4 sm:$0xff]   ;;  %v3239_v50 = vld [vmem:[%s5153_s6 + $0x10] ss:$8 sps:$4 sm:$0xff]   ;;  %v3241_v51 = vld [vmem:[%s5153_s6 + $0x14] ss:$8 sps:$4 sm:$0xff]  }
  0x10   :  { %3161 = vmatprep.subr.bf16.mxu1 %v3186_v9  ;;  %332 = vmatprep.subr.bf16.mxu0 %v3186_v9  ;;  %v3244_v52 = vld [vmem:[%s5153_s6 + $0x4] ss:$8 sps:$4 sm:$0xff]   ;;  %v97_v53 = vld [vmem:[%s5148_s1 + $0x58] sm:$0xf]  ;;  %v98_v54 = vld [vmem:[%s5148_s1 + $0x5c] sm:$0xf] }
  0x11   :  { %v3614_v55 = vld [vmem:[%s5148_s1 + $0x18] sm:$0xf]  ;;  %v3619_v56 = vld [vmem:[%s5148_s1 + $0x1c] sm:$0xf]  ;;  %v3624_v57 = vld [vmem:[%s5154_s7 + $0x10] sm:$0x33]  ;;  %v2967_v8 = vcombine.low %v97_v53, %v98_v54 }
  0x12   :  { %v3629_v58 = vld [vmem:[%s5147_s0 + $0x40] sm:$0xf]  ;;  %v3639_v60 = vld [vmem:[%s5147_s0 + $0x44] sm:$0xf]  ;;  %v3644_v61 = vld [vmem:[%s5147_s0 + $0x48] sm:$0xf]  ;;  %v3107_v5 = vcombine.high %v3624_v57, %v3624_v57  ;;  %v2959_v9 = vcombine.low %v3614_v55, %v3619_v56 }
  0x13   :  { %3167 = vmatpush1.bf16.msra.mxu1 %v3188_v10  ;;  %333 = vmatpush1.bf16.msra.mxu0 %v3188_v10  ;;  %v3231_v59 = vld [vmem:[%s5151_s4] ss:$8 sps:$4 sm:$0xff]   ;;  %v3649_v62 = vld [vmem:[%s5147_s0 + $0x4c] sm:$0xf]  ;;  %v3659_v0 = vld [vmem:[%s5147_s0 + $0x50] sm:$0xf]  ;;  %v910_v6 = vmul.bf16 %v3462_v13, %v3629_v58  ;;  %v911_v7 = vmul.bf16 %v3467_v14, %v3639_v60  ;;  %v912_v10 = vmul.bf16 %v3498_v23, %v3644_v61 }
  0x14   :  { %3162 = vmatprep.subr.bf16.mxu1 %v3189_v11  ;;  %334 = vmatprep.subr.bf16.mxu0 %v3189_v11  ;;  %v3242_v63 = vld [vmem:[%s5153_s6] ss:$8 sps:$4 sm:$0xff]   ;;  %v3664_v1 = vld [vmem:[%s5147_s0 + $0x54] sm:$0xf]  ;;  %v3669_v3 = vld [vmem:[%s5147_s0 + $0x58] sm:$0xf]  ;;  %v913_v11 = vmul.bf16 %v3503_v24, %v3649_v62 }
  0x15   :  { %v3674_v4 = vld [vmem:[%s5147_s0 + $0x5c] sm:$0xf]  ;;  %v915_v13 = vmul.bf16 %v3564_v40, %v3664_v1  ;;  %v3712_v23 = vld [vmem:[%s5148_s1 + $0x24] sm:$0xf]  ;;  %v3767_v40 = vld [vmem:[%s5147_s0 + $0x6c] sm:$0xf] }
  0x16   :  { %v3694_v14 = vcombine.low %v912_v10, %v913_v11 }
  0x17   :  { %3168 = vmatpush1.bf16.msra.mxu1 %v3191_v12  ;;  %335 = vmatpush1.bf16.msra.mxu0 %v3191_v12  ;;  %v3688_v12 = vcombine.low %v910_v6, %v911_v7 }
  0x18   :  { %705 = vmatprep.subr.bf16.mxu1 %v3195_v17  ;;  %1130 = vmatprep.subr.bf16.mxu0 %v3219_v21  ;;  %v914_v17 = vmul.bf16 %v3547_v36, %v3659_v0  ;;  %v100_v21 = vld [vmem:[%s5148_s1 + $0x64] sm:$0xf]  ;;  %v3746_v36 = vld [vmem:[%s5148_s1 + $0x28] sm:$0xf] }
  0x1a   :  { %2992 = vmatmul.mubr.msk.bf16.vlgmr.msra.gmra.mxu1 %vm271_vm0, %v2964_v18  ;;  %2984 = vmatmul.mubr.msk.bf16.vlgmr.msra.gmra.mxu0 %vm271_vm0, %v2956_v20  ;;  %v916_v18 = vmul.bf16 %v97_v53, %v3669_v3  ;;  %v99_v20 = vld [vmem:[%s5148_s1 + $0x60] sm:$0xf]  ;;  %v3715_v24 = vcombine.low %v914_v17, %v915_v13 }
  0x1b   :  { %706 = vmatpush1.bf16.msra.mxu1 %v3193_v19  ;;  %442 = vmatprep.mubr.bf16.mxu1 %v5160_v2  ;;  %v917_v19 = vmul.bf16 %v98_v54, %v3674_v4 }
  0x1c   :  { %362 = vmatprep.mubr.bf16.mxu0 %v5160_v2  ;;  %707 = vmatprep.subr.bf16.mxu1 %v3202_v22  ;;  %v3707_v22 = vld [vmem:[%s5148_s1 + $0x20] sm:$0xf] }
  0x1d   :  { %1131 = vmatpush1.bf16.msra.mxu0 %v3217_v25  ;;  %v3719_v25 = vcombine.low %v916_v18, %v917_v19 }
  0x1e   :  { %1132 = vmatprep.subr.bf16.mxu0 %v3225_v28  ;;  %v3726_v28 = vld [vmem:[%s5147_s0 + $0x60] sm:$0xf] }
  0x1f   :  { %708 = vmatpush1.bf16.msra.mxu1 %v3200_v29  ;;  %v3731_v29 = vld [vmem:[%s5147_s0 + $0x64] sm:$0xf] }
  0x20   :  { %709 = vmatprep.subr.bf16.mxu1 %v3207_v30  ;;  %v2968_v30 = vcombine.low %v99_v20, %v100_v21 }
  0x21   :  { %1133 = vmatpush1.bf16.msra.mxu0 %v3223_v31  ;;  %v2960_v31 = vcombine.low %v3707_v22, %v3712_v23 }
  0x22   :  { %2993 = vmatmul.mubr.msk.bf16.gmra.mxu1 %vm271_vm0, %v2965_v32  ;;  %2985 = vmatmul.mubr.msk.bf16.gmra.mxu0 %vm271_vm0, %v2957_v33  ;;  %v918_v32 = vmul.bf16 %v99_v20, %v3726_v28  ;;  %v919_v33 = vmul.bf16 %v100_v21, %v3731_v29 }
  0x23   :  { %452 = vmatprep.mubr.bf16.mxu1 %v5160_v2  ;;  %372 = vmatprep.mubr.bf16.mxu0 %v5160_v2 }
  0x24   :  { %710 = vmatpush1.bf16.msra.mxu1 %v3205_v34  ;;  %1134 = vmatprep.subr.bf16.mxu0 %v3230_v35  ;;  %v101_v34 = vld [vmem:[%s5148_s1 + $0x68] sm:$0xf]  ;;  %v102_v35 = vld [vmem:[%s5148_s1 + $0x6c] sm:$0xf] }
  0x25   :  { %711 = vmatprep.subr.bf16.mxu1 %v3213_v37  ;;  %1135 = vmatpush1.bf16.msra.mxu0 %v3228_v38  ;;  %v3751_v37 = vld [vmem:[%s5148_s1 + $0x2c] sm:$0xf]  ;;  %v3755_v38 = vcombine.low %v918_v32, %v919_v33 }
  0x26   :  { %1136 = vmatprep.subr.bf16.mxu0 %v3236_v39  ;;  %v3762_v39 = vld [vmem:[%s5147_s0 + $0x68] sm:$0xf] }
  0x28   :  { %712 = vmatpush1.bf16.msra.mxu1 %v3211_v43  ;;  %v2969_v43 = vcombine.low %v101_v34, %v102_v35 }
  0x29   :  { %713 = vmatprep.subr.bf16.mxu1 %v3222_v44  ;;  %1137 = vmatpush1.bf16.msra.mxu0 %v3234_v45  ;;  %v2961_v44 = vcombine.low %v3746_v36, %v3751_v37  ;;  %v920_v45 = vmul.bf16 %v101_v34, %v3762_v39 }
  0x2a   :  { %2994 = vmatmul.mubr.msk.bf16.gmra.mxu1 %vm271_vm0, %v2966_v46  ;;  %2986 = vmatmul.mubr.msk.bf16.gmra.mxu0 %vm271_vm0, %v2958_v47  ;;  %v921_v46 = vmul.bf16 %v102_v35, %v3767_v40  ;;  %v103_v47 = vld [vmem:[%s5148_s1 + $0x70] sm:$0xf] }
  0x2b   :  { %462 = vmatprep.mubr.bf16.mxu1 %v5160_v2  ;;  %382 = vmatprep.mubr.bf16.mxu0 %v5160_v2 }
  0x2c   :  { %714 = vmatpush1.bf16.msra.mxu1 %v3220_v48  ;;  %1138 = vmatprep.subr.bf16.mxu0 %v3241_v51  ;;  %v104_v48 = vld [vmem:[%s5148_s1 + $0x74] sm:$0xf] }
  0x2d   :  { %715 = vmatprep.subr.bf16.mxu1 %v3233_v49  ;;  %1139 = vmatpush1.bf16.msra.mxu0 %v3239_v50  ;;  %v3781_v49 = vcombine.low %v920_v45, %v921_v46  ;;  %v3788_v50 = vld [vmem:[%s5148_s1 + $0x30] sm:$0xf]  ;;  %v3793_v51 = vld [vmem:[%s5148_s1 + $0x34] sm:$0xf] }
  0x2e   :  { %1140 = vmatprep.subr.bf16.mxu0 %v3244_v52 }
  0x30   :  { %716 = vmatpush1.bf16.msra.mxu1 %v3231_v59 }
  0x31   :  { %1141 = vmatpush1.bf16.msra.mxu0 %v3242_v63  ;;  %3108 = vmatprep.subr.msk.bf16.mxu1 %vm1562_vm1, %v3107_v5 }
  0x32   :  { %2995 = vmatmul.mubr.msk.bf16.gmra.mxu1 %vm271_vm0, %v2967_v8  ;;  %2987 = vmatmul.mubr.msk.bf16.gmra.mxu0 %vm271_vm0, %v2959_v9 }
  0x33   :  { %472 = vmatprep.mubr.bf16.mxu1 %v5160_v2  ;;  %392 = vmatprep.mubr.bf16.mxu0 %v5160_v2 }
  0x3a   :  { %2996 = vmatmul.mubr.msk.bf16.gmra.mxu1 %vm271_vm0, %v2968_v30  ;;  %2988 = vmatmul.mubr.msk.bf16.gmra.mxu0 %vm271_vm0, %v2960_v31 }
  0x3b   :  { %482 = vmatprep.mubr.bf16.mxu1 %v5160_v2  ;;  %402 = vmatprep.mubr.bf16.mxu0 %v5160_v2 }
  0x42   :  { %2997 = vmatmul.mubr.msk.bf16.gmra.mxu1 %vm271_vm0, %v2969_v43  ;;  %2989 = vmatmul.mubr.msk.bf16.gmra.mxu0 %vm271_vm0, %v2961_v44 }
  0x43   :  { %492 = vmatprep.mubr.bf16.mxu1 %v5160_v2  ;;  %412 = vmatprep.mubr.bf16.mxu0 %v5160_v2 }
  0x44   :  { %17 = vsyncpa [#allocation3], 0  ;;  %v3798_v52 = vld [vmem:[%s5147_s0 + $0x70] sm:$0xf]  ;;  %v3803_v53 = vld [vmem:[%s5147_s0 + $0x74] sm:$0xf]  ;;  %v2970_v54 = vcombine.low %v103_v47, %v104_v48  ;;  %v2962_v59 = vcombine.low %v3788_v50, %v3793_v51  ;;  %v3106_v34 = vcombine.low %v3624_v57, %v3624_v57 }
  0x45   :  { %v922_v63 = vmul.bf16 %v103_v47, %v3798_v52  ;;  %v923_v5 = vmul.bf16 %v104_v48, %v3803_v53  ;;  %v105_v6 = vld [vmem:[%s5148_s1 + $0x78] sm:$0xf]  ;;  %v106_v8 = vld [vmem:[%s5148_s1 + $0x7c] sm:$0xf]  ;;  %v43_v19 = vld [vmem:[%s5147_s0] sm:$0xf] }
  0x46   :  { %v3824_v9 = vld [vmem:[%s5148_s1 + $0x38] sm:$0xf]  ;;  %v3829_v10 = vld [vmem:[%s5148_s1 + $0x3c] sm:$0xf]  ;;  %v2971_v13 = vcombine.low %v105_v6, %v106_v8  ;;  %v44_v20 = vld [vmem:[%s5147_s0 + $0x4] sm:$0xf]  ;;  %v894_v31 = vmul.bf16 %v3472_v15, %v43_v19 }
  0x47   :  { %v3814_v7 = vcombine.low %v922_v63, %v923_v5  ;;  %v3834_v11 = vld [vmem:[%s5147_s0 + $0x78] sm:$0xf]  ;;  %v3839_v17 = vld [vmem:[%s5147_s0 + $0x7c] sm:$0xf]  ;;  %v2963_v18 = vcombine.low %v3824_v9, %v3829_v10  ;;  %v895_v32 = vmul.bf16 %v3477_v16, %v44_v20  ;;  %v3000_v35 = vcombine.low %v43_v19, %v44_v20  ;;  %v45_v15 = vld [vmem:[%s5147_s0 + $0x8] sm:$0xf] }
  0x48   :  { %v924_v21 = vmul.bf16 %v105_v6, %v3834_v11  ;;  %v925_v30 = vmul.bf16 %v106_v8, %v3839_v17  ;;  %v46_v16 = vld [vmem:[%s5147_s0 + $0xc] sm:$0xf]  ;;  %v1564_v44 = vsel %vm1562_vm1, %v3106_v34, 0  ;;  %v896_v57 = vmul.bf16 %v3513_v26, %v45_v15  ;;  %v3255_v47 = vld [vmem:[%s5154_s7] ss:$8 sps:$4 sm:$0xff]   ;;  %s3353_s1 = smov [#allocation2]  }
  0x49   :  { %v3044_v43 = vcombine.low %v894_v31, %v895_v32  ;;  %v3257_v45 = vld [vmem:[%s5154_s7 + $0x4] ss:$8 sps:$4 sm:$0xff]   ;;  %v897_v46 = vmul.bf16 %v3518_v27, %v46_v16  ;;  %v3001_v48 = vcombine.low %v45_v15, %v46_v16  ;;  %v48_v26 = vld [vmem:[%s5147_s0 + $0x14] sm:$0xf]  ;;  %v49_v8 = vld [vmem:[%s5147_s0 + $0x18] sm:$0xf] }
  0x4a   :  { %2998 = vmatmul.mubr.msk.bf16.gmra.mxu1 %vm271_vm0, %v2970_v54  ;;  %2990 = vmatmul.mubr.msk.bf16.gmra.mxu0 %vm271_vm0, %v2962_v59  ;;  %v3855_v33 = vcombine.low %v924_v21, %v925_v30  ;;  %v47_v59 = vld [vmem:[%s5147_s0 + $0x10] sm:$0xf]  ;;  %v899_v63 = vmul.bf16 %v3575_v42, %v48_v26  ;;  %v51_v20 = vld [vmem:[%s5147_s0 + $0x20] sm:$0xf]  ;;  %v52_v21 = vld [vmem:[%s5147_s0 + $0x24] sm:$0xf] }
  0x4b   :  { %502 = vmatprep.mubr.bf16.mxu1 %v5160_v2  ;;  %422 = vmatprep.mubr.bf16.mxu0 %v5160_v2  ;;  %v3045_v54 = vcombine.low %v896_v57, %v897_v46  ;;  %v898_v27 = vmul.bf16 %v3570_v41, %v47_v59  ;;  %v3002_v5 = vcombine.low %v47_v59, %v48_v26  ;;  %v53_v32 = vld [vmem:[%s5147_s0 + $0x28] sm:$0xf]  ;;  %v54_v34 = vld [vmem:[%s5147_s0 + $0x2c] sm:$0xf]  ;;  %v55_v15 = vld [vmem:[%s5147_s0 + $0x30] sm:$0xf] }
  0x4c   :  { %v900_v41 = vmul.bf16 %v3614_v55, %v49_v8  ;;  %v902_v55 = vmul.bf16 %v3707_v22, %v51_v20  ;;  %v3004_v30 = vcombine.low %v51_v20, %v52_v21  ;;  %v904_v22 = vmul.bf16 %v3746_v36, %v53_v32  ;;  %v56_v16 = vld [vmem:[%s5147_s0 + $0x34] sm:$0xf]  ;;  %v57_v57 = vld [vmem:[%s5147_s0 + $0x38] sm:$0xf]  ;;  %v58_v46 = vld [vmem:[%s5147_s0 + $0x3c] sm:$0xf] }
  0x4d   :  { %v3046_v6 = vcombine.low %v898_v27, %v899_v63  ;;  %v906_v36 = vmul.bf16 %v3788_v50, %v55_v15  ;;  %v908_v50 = vmul.bf16 %v3824_v9, %v57_v57  ;;  %v3009_v9 = vcombine.low %v3644_v61, %v3649_v62  ;;  %v3278_v61 = vld [vmem:[%s5156_s9 + $0x74] ss:$8 sps:$4 sm:$0xff]   ;;  %v3266_v27 = vld [vmem:[%s5149_s2 + $0x8] sm:$0xff]  }
  0x4e   :  { %2202 = vmatprep.subr.bf16.mxu0 %v3278_v61  ;;  %v3011_v62 = vcombine.low %v3669_v3, %v3674_v4  ;;  %v3012_v3 = vcombine.low %v3726_v28, %v3731_v29  ;;  %v3284_v4 = vld [vmem:[%s5156_s9 + $0x50] ss:$8 sps:$4 sm:$0xff]   ;;  %v3014_v28 = vcombine.low %v3798_v52, %v3803_v53  ;;  %v3265_v52 = vld [vmem:[%s5149_s2] sm:$0xff]   ;;  %vm1513_vm2 = vcmask 162816  }
  0x4f   :  { %v3292_v29 = vld [vmem:[%s5156_s9 + $0x30] ss:$8 sps:$4 sm:$0xff]  }
  0x50   :  { %v3311_v61 = vld [vmem:[%s5156_s9 + $0xd0] ss:$8 sps:$4 sm:$0xff]  }
  0x52   :  { %2999 = vmatmul.mubr.msk.bf16.gmra.mxu1 %vm271_vm0, %v2971_v13  ;;  %2991 = vmatmul.mubr.msk.bf16.gmra.mxu0 %vm271_vm0, %v2963_v18  ;;  %v50_v13 = vld [vmem:[%s5147_s0 + $0x1c] sm:$0xf] }
  0x53   :  { %733 = vmatprep.mubr.bf16.mxu1 %v5160_v2  ;;  %1158 = vmatprep.mubr.bf16.mxu0 %v5160_v2  ;;  %v901_v42 = vmul.bf16 %v3619_v56, %v50_v13  ;;  %v3003_v18 = vcombine.low %v49_v8, %v50_v13  ;;  %v903_v56 = vmul.bf16 %v3712_v23, %v52_v21  ;;  %v3302_v13 = vld [vmem:[%s5156_s9] ss:$8 sps:$4 sm:$0xff]   ;;  %v3267_v21 = vld [vmem:[%s5149_s2 + $0x10] sm:$0xff]  }
  0x54   :  { %v905_v23 = vmul.bf16 %v3751_v37, %v54_v34  ;;  %v907_v37 = vmul.bf16 %v3793_v51, %v56_v16  ;;  %v909_v51 = vmul.bf16 %v3829_v10, %v58_v46  ;;  %v3299_v10 = vld [vmem:[%s5156_s9 + $0x10] ss:$8 sps:$4 sm:$0xff]  }
  0x55   :  { %v3047_v19 = vcombine.low %v900_v41, %v901_v42  ;;  %v3048_v31 = vcombine.low %v902_v55, %v903_v56  ;;  %v3304_v41 = vld [vmem:[%s5156_s9 + $0x4] ss:$8 sps:$4 sm:$0xff]  }
  0x5a   :  { %3028 = vmatmul.mubr.msk.bf16.vlgmr.msra.gmra.mxu1 %vm271_vm0, %v3000_v35  ;;  %3072 = vmatmul.mubr.msk.bf16.vlgmr.msra.gmra.mxu0 %vm271_vm0, %v3044_v43  ;;  %v3005_v35 = vcombine.low %v53_v32, %v54_v34  ;;  %v3049_v43 = vcombine.low %v904_v22, %v905_v23  ;;  %v3305_v32 = vld [vmem:[%s5156_s9 + $0xf0] ss:$8 sps:$4 sm:$0xff]   ;;  %v3307_v34 = vld [vmem:[%s5156_s9 + $0xf4] ss:$8 sps:$4 sm:$0xff]  }
  0x5b   :  { %1582 = vmatpush1.bf16.msra.mxu1 %v1564_v44  ;;  %743 = vmatprep.mubr.bf16.mxu1 %v5160_v2  ;;  %v3006_v44 = vcombine.low %v55_v15, %v56_v16  ;;  %v3268_v15 = vld [vmem:[%s5149_s2 + $0x18] sm:$0xff]  }
  0x5c   :  { %1168 = vmatprep.mubr.bf16.mxu0 %v5160_v2  ;;  %1583 = vmatprep.subr.bf16.mxu1 %v3257_v45  ;;  %v3050_v45 = vcombine.low %v906_v36, %v907_v37 }
  0x5f   :  { %1584 = vmatpush1.bf16.msra.mxu1 %v3255_v47  ;;  %v3007_v47 = vcombine.low %v57_v57, %v58_v46  ;;  %v3310_v57 = vld [vmem:[%s5156_s9 + $0xe4] ss:$8 sps:$4 sm:$0xff]  }
  0x62   :  { %3029 = vmatmul.mubr.msk.bf16.gmra.mxu1 %vm271_vm0, %v3001_v48  ;;  %3073 = vmatmul.mubr.msk.bf16.gmra.mxu0 %vm271_vm0, %v3045_v54  ;;  %v3051_v48 = vcombine.low %v908_v50, %v909_v51  ;;  %v3008_v54 = vcombine.low %v3629_v58, %v3639_v60  ;;  %v3010_v58 = vcombine.low %v3659_v0, %v3664_v1  ;;  %v3276_v60 = vld [vmem:[%s5156_s9 + $0x70] ss:$8 sps:$4 sm:$0xff]   ;;  %v3280_v0 = vld [vmem:[%s5156_s9 + $0x60] ss:$8 sps:$4 sm:$0xff]   ;;  %v3282_v1 = vld [vmem:[%s5156_s9 + $0x64] ss:$8 sps:$4 sm:$0xff]  }
  0x63   :  { %753 = vmatprep.mubr.bf16.mxu1 %v5160_v2  ;;  %1178 = vmatprep.mubr.bf16.mxu0 %v5160_v2 }
  0x64   :  { %2203 = vmatpush1.bf16.msra.mxu0 %v3276_v60 }
  0x65   :  { %2204 = vmatprep.subr.bf16.mxu0 %v3282_v1 }
  0x68   :  { %2205 = vmatpush1.bf16.msra.mxu0 %v3280_v0 }
  0x6a   :  { %3030 = vmatmul.mubr.msk.bf16.gmra.mxu1 %vm271_vm0, %v3002_v5  ;;  %3074 = vmatmul.mubr.msk.bf16.gmra.mxu0 %vm271_vm0, %v3046_v6 }
  0x6b   :  { %763 = vmatprep.mubr.bf16.mxu1 %v5160_v2  ;;  %1188 = vmatprep.mubr.bf16.mxu0 %v5160_v2 }
  0x72   :  { %3031 = vmatmul.mubr.msk.bf16.gmra.mxu1 %vm271_vm0, %v3003_v18  ;;  %3075 = vmatmul.mubr.msk.bf16.gmra.mxu0 %vm271_vm0, %v3047_v19 }
  0x73   :  { %773 = vmatprep.mubr.bf16.mxu1 %v5160_v2  ;;  %1198 = vmatprep.mubr.bf16.mxu0 %v5160_v2 }
  0x7a   :  { %3032 = vmatmul.mubr.msk.bf16.gmra.mxu1 %vm271_vm0, %v3004_v30  ;;  %3076 = vmatmul.mubr.msk.bf16.gmra.mxu0 %vm271_vm0, %v3048_v31 }
  0x7b   :  { %783 = vmatprep.mubr.bf16.mxu1 %v5160_v2  ;;  %1208 = vmatprep.mubr.bf16.mxu0 %v5160_v2 }
  0x82   :  { %3033 = vmatmul.mubr.msk.bf16.gmra.mxu1 %vm271_vm0, %v3005_v35  ;;  %3077 = vmatmul.mubr.msk.bf16.gmra.mxu0 %vm271_vm0, %v3049_v43 }
  0x83   :  { %793 = vmatprep.mubr.bf16.mxu1 %v5160_v2  ;;  %1218 = vmatprep.mubr.bf16.mxu0 %v5160_v2 }
  0x8a   :  { %3034 = vmatmul.mubr.msk.bf16.gmra.mxu1 %vm271_vm0, %v3006_v44  ;;  %3078 = vmatmul.mubr.msk.bf16.gmra.mxu0 %vm271_vm0, %v3050_v45  ;;  %v3308_v45 = vld [vmem:[%s5156_s9 + $0xe0] ss:$8 sps:$4 sm:$0xff]  }
  0x8b   :  { %803 = vmatprep.mubr.bf16.mxu1 %v5160_v2  ;;  %1228 = vmatprep.mubr.bf16.mxu0 %v5160_v2 }
  0x92   :  { %3035 = vmatmul.mubr.msk.bf16.gmra.mxu1 %vm271_vm0, %v3007_v47  ;;  %3079 = vmatmul.mubr.msk.bf16.gmra.mxu0 %vm271_vm0, %v3051_v48  ;;  %v3269_v48 = vld [vmem:[%s5149_s2 + $0x20] sm:$0xff]  }
  0x93   :  { %813 = vmatprep.mubr.bf16.mxu1 %v5160_v2  ;;  %1238 = vmatprep.mubr.bf16.mxu0 %v5160_v2 }
  0x9a   :  { %3036 = vmatmul.mubr.msk.bf16.gmra.mxu1 %vm271_vm0, %v3008_v54  ;;  %3080 = vmatmul.mubr.msk.bf16.gmra.mxu0 %vm271_vm0, %v3688_v12  ;;  %v3286_v12 = vld [vmem:[%s5156_s9 + $0x54] ss:$8 sps:$4 sm:$0xff]  }
  0x9b   :  { %823 = vmatprep.mubr.bf16.mxu1 %v5160_v2  ;;  %1248 = vmatprep.mubr.bf16.mxu0 %v5160_v2 }
  0x9c   :  { %2206 = vmatprep.subr.bf16.mxu0 %v3286_v12  ;;  %v3270_v12 = vld [vmem:[%s5149_s2 + $0x28] sm:$0xff]  }
  0x9d   :  { %2207 = vmatpush1.bf16.msra.mxu0 %v3284_v4 }
  0xa2   :  { %3037 = vmatmul.mubr.msk.bf16.gmra.mxu1 %vm271_vm0, %v3009_v9  ;;  %3081 = vmatmul.mubr.msk.bf16.gmra.mxu0 %vm271_vm0, %v3694_v14  ;;  %v3013_v14 = vcombine.low %v3762_v39, %v3767_v40  ;;  %v3015_v39 = vcombine.low %v3834_v11, %v3839_v17  ;;  %v3296_v40 = vld [vmem:[%s5156_s9 + $0x20] ss:$8 sps:$4 sm:$0xff]   ;;  %v3301_v11 = vld [vmem:[%s5156_s9 + $0x14] ss:$8 sps:$4 sm:$0xff]  }
  0xa3   :  { %833 = vmatprep.mubr.bf16.mxu1 %v5160_v2  ;;  %1258 = vmatprep.mubr.bf16.mxu0 %v5160_v2 }
  0xaa   :  { %3038 = vmatmul.mubr.msk.bf16.gmra.mxu1 %vm271_vm0, %v3010_v58  ;;  %3082 = vmatmul.mubr.msk.bf16.gmra.mxu0 %vm271_vm0, %v3715_v24  ;;  %v3288_v24 = vld [vmem:[%s5156_s9 + $0x40] ss:$8 sps:$4 sm:$0xff]  }
  0xab   :  { %843 = vmatprep.mubr.bf16.mxu1 %v5160_v2  ;;  %1268 = vmatprep.mubr.bf16.mxu0 %v5160_v2 }
  0xb2   :  { %3039 = vmatmul.mubr.msk.bf16.gmra.mxu1 %vm271_vm0, %v3011_v62  ;;  %3083 = vmatmul.mubr.msk.bf16.gmra.mxu0 %vm271_vm0, %v3719_v25  ;;  %v3290_v25 = vld [vmem:[%s5156_s9 + $0x44] ss:$8 sps:$4 sm:$0xff]   ;;  %v3313_v62 = vld [vmem:[%s5156_s9 + $0xd4] ss:$8 sps:$4 sm:$0xff]  }
  0xb3   :  { %853 = vmatprep.mubr.bf16.mxu1 %v5160_v2  ;;  %1278 = vmatprep.mubr.bf16.mxu0 %v5160_v2 }
  0xb4   :  { %2208 = vmatprep.subr.bf16.mxu0 %v3290_v25 }
  0xb5   :  { %2209 = vmatpush1.bf16.msra.mxu0 %v3288_v24 }
  0xba   :  { %3040 = vmatmul.mubr.msk.bf16.gmra.mxu1 %vm271_vm0, %v3012_v3  ;;  %3084 = vmatmul.mubr.msk.bf16.gmra.mxu0 %vm271_vm0, %v3755_v38  ;;  %v3294_v38 = vld [vmem:[%s5156_s9 + $0x34] ss:$8 sps:$4 sm:$0xff]  }
  0xbb   :  { %863 = vmatprep.mubr.bf16.mxu1 %v5160_v2  ;;  %1288 = vmatprep.mubr.bf16.mxu0 %v5160_v2 }
  0xbc   :  { %2210 = vmatprep.subr.bf16.mxu0 %v3294_v38  ;;  %v3316_v38 = vld [vmem:[%s5156_s9 + $0xc4] ss:$8 sps:$4 sm:$0xff]  }
  0xbd   :  { %2211 = vmatpush1.bf16.msra.mxu0 %v3292_v29  ;;  %v3314_v29 = vld [vmem:[%s5156_s9 + $0xc0] ss:$8 sps:$4 sm:$0xff]  }
  0xc2   :  { %3041 = vmatmul.mubr.msk.bf16.gmra.mxu1 %vm271_vm0, %v3013_v14  ;;  %3085 = vmatmul.mubr.msk.bf16.gmra.mxu0 %vm271_vm0, %v3781_v49  ;;  %v3298_v49 = vld [vmem:[%s5156_s9 + $0x24] ss:$8 sps:$4 sm:$0xff]  }
  0xc3   :  { %873 = vmatprep.mubr.bf16.mxu1 %v5160_v2  ;;  %1298 = vmatprep.mubr.bf16.mxu0 %v5160_v2 }
  0xc4   :  { %2212 = vmatprep.subr.bf16.mxu0 %v3298_v49 }
  0xc5   :  { %2213 = vmatpush1.bf16.msra.mxu0 %v3296_v40 }
  0xc6   :  { %2214 = vmatprep.subr.bf16.mxu0 %v3301_v11 }
  0xc9   :  { %2215 = vmatpush1.bf16.msra.mxu0 %v3299_v10  ;;  %v3271_v10 = vld [vmem:[%s5149_s2 + $0x30] sm:$0xff]  }
  0xca   :  { %3042 = vmatmul.mubr.msk.bf16.gmra.mxu1 %vm271_vm0, %v3014_v28  ;;  %3086 = vmatmul.mubr.msk.bf16.gmra.mxu0 %vm271_vm0, %v3814_v7 }
  0xcb   :  { %883 = vmatprep.mubr.bf16.mxu1 %v5160_v2  ;;  %1308 = vmatprep.mubr.bf16.mxu0 %v5160_v2 }
  0xcc   :  { %2216 = vmatprep.subr.bf16.mxu0 %v3304_v41 }
  0xcd   :  { %2217 = vmatpush1.bf16.msra.mxu0 %v3302_v13 }
  0xce   :  { %2218 = vmatprep.subr.bf16.mxu0 %v3307_v34 }
  0xd1   :  { %2219 = vmatpush2.bf16.msra.mxu0 %v3305_v32  ;;  %v3319_v32 = vld [vmem:[%s5156_s9 + $0xb4] ss:$8 sps:$4 sm:$0xff]  }
  0xd2   :  { %3043 = vmatmul.mubr.msk.bf16.gmra.mxu1 %vm271_vm0, %v3015_v39  ;;  %3087 = vmatmul.mubr.msk.bf16.gmra.mxu0 %vm271_vm0, %v3855_v33 }
  0xd3   :  { %1601 = vmatprep.mubr.bf16.mxu1 %v5160_v2  ;;  %2220 = vmatprep.subr.bf16.mxu0 %v3310_v57 }
  0xd5   :  { %2221 = vmatpush2.bf16.msra.mxu0 %v3308_v45 }
  0xd6   :  { %2222 = vmatprep.subr.bf16.mxu0 %v3313_v62 }
  0xd9   :  { %2223 = vmatpush2.bf16.msra.mxu0 %v3311_v61 }
  0xda   :  { %v4050_v53 = vpop.f32.mrf.mxu1  ;;  %3109 = vmatmul.mubr.msk.bf16.vlgmr.msra.gmra.mxu1 %vm1513_vm2, %v3265_v52  ;;  %v4053_v7 = vpop.f32.mrf.mxu0  ;;  %2224 = vmatprep.subr.bf16.mxu0 %v3316_v38  ;;  %v3320_v38 = vld [vmem:[%s5156_s9 + $0xa0] ss:$8 sps:$4 sm:$0xff]  }
  0xdb   :  { %5163 = vst [vmem:[#allocation5_spill] sm:$0xff] %v4050_v53  ;;  %1611 = vmatprep.mubr.bf16.mxu1 %v5160_v2 }
  0xdc   :  { %v4062_v17 = vpop.f32.mrf.mxu1  ;;  %v4064_v33 = vpop.f32.mrf.mxu0 }
  0xdd   :  { %5164 = vst [vmem:[#allocation6_spill] sm:$0xff] %v4062_v17  ;;  %2225 = vmatpush2.bf16.msra.mxu0 %v3314_v29 }
  0xde   :  { %v4066_v59 = vpop.f32.mrf.mxu1  ;;  %v4068_v26 = vpop.f32.mrf.mxu0  ;;  %2226 = vmatprep.subr.bf16.mxu0 %v3319_v32 }
  0xdf   :  { %5165 = vst [vmem:[#allocation7_spill] sm:$0xff] %v4066_v59 }
  0xe0   :  { %v4073_v63 = vpop.f32.mrf.mxu1  ;;  %v4075_v5 = vpop.f32.mrf.mxu0 }
  0xe1   :  { %5166 = vst [vmem:[#allocation8_spill] sm:$0xff] %v4073_v63 }
  0xe2   :  { %v4077_v6 = vpop.f32.mrf.mxu1  ;;  %3110 = vmatmul.mubr.msk.bf16.gmra.mxu1 %vm1513_vm2, %v3266_v27  ;;  %v4080_v8 = vpop.f32.mrf.mxu0 }
  0xe3   :  { %5167 = vst [vmem:[#allocation9_spill] sm:$0xff] %v4077_v6  ;;  %1621 = vmatprep.mubr.bf16.mxu1 %v5160_v2 }
  0xe4   :  { %v4089_v42 = vpop.f32.mrf.mxu1  ;;  %v4091_v18 = vpop.f32.mrf.mxu0 }
  0xe5   :  { %5168 = vst [vmem:[#allocation10_spill] sm:$0xff] %v4089_v42 }
  0xe6   :  { %v4093_v19 = vpop.f32.mrf.mxu1  ;;  %v4095_v20 = vpop.f32.mrf.mxu0 }
  0xe7   :  { %5169 = vst [vmem:[#allocation11_spill] sm:$0xff] %v4093_v19 }
  0xe8   :  { %v4100_v55 = vpop.f32.mrf.mxu1  ;;  %v4102_v56 = vpop.f32.mrf.mxu0 }
  0xe9   :  { %5170 = vst [vmem:[#allocation12_spill] sm:$0xff] %v4100_v55 }
  0xea   :  { %v4104_v30 = vpop.f32.mrf.mxu1  ;;  %3111 = vmatmul.mubr.msk.bf16.gmra.mxu1 %vm1513_vm2, %v3267_v21  ;;  %v4107_v31 = vpop.f32.mrf.mxu0  ;;  %v3317_v21 = vld [vmem:[%s5156_s9 + $0xb0] ss:$8 sps:$4 sm:$0xff]  }
  0xeb   :  { %5171 = vst [vmem:[#allocation13_spill] sm:$0xff] %v4104_v30  ;;  %1631 = vmatprep.mubr.bf16.mxu1 %v5160_v2  ;;  %2227 = vmatpush2.bf16.msra.mxu0 %v3317_v21 }
  0xec   :  { %v4116_v22 = vpop.f32.mrf.mxu1  ;;  %v4118_v23 = vpop.f32.mrf.mxu0 }
  0xed   :  { %5172 = vst [vmem:[#allocation14_spill] sm:$0xff] %v4116_v22 }
  0xee   :  { %v4120_v35 = vpop.f32.mrf.mxu1  ;;  %v4122_v43 = vpop.f32.mrf.mxu0 }
  0xef   :  { %5173 = vst [vmem:[#allocation15_spill] sm:$0xff] %v4120_v35 }
  0xf0   :  { %v4127_v16 = vpop.f32.mrf.mxu1  ;;  %v4129_v36 = vpop.f32.mrf.mxu0 }
  0xf1   :  { %5174 = vst [vmem:[#allocation16_spill] sm:$0xff] %v4127_v16 }
  0xf2   :  { %v4131_v37 = vpop.f32.mrf.mxu1  ;;  %3112 = vmatmul.mubr.msk.bf16.gmra.mxu1 %vm1513_vm2, %v3268_v15  ;;  %v4134_v44 = vpop.f32.mrf.mxu0 }
  0xf3   :  { %5175 = vst [vmem:[#allocation17_spill] sm:$0xff] %v4131_v37  ;;  %1641 = vmatprep.mubr.bf16.mxu1 %v5160_v2 }
  0xf4   :  { %v4143_v46 = vpop.f32.mrf.mxu1  ;;  %v4145_v50 = vpop.f32.mrf.mxu0 }
  0xf5   :  { %5176 = vst [vmem:[#allocation18_spill] sm:$0xff] %v4143_v46 }
  0xf6   :  { %v4147_v51 = vpop.f32.mrf.mxu1  ;;  %v4149_v47 = vpop.f32.mrf.mxu0 }
  0xf7   :  { %5177 = vst [vmem:[#allocation19_spill] sm:$0xff] %v4147_v51 }
  0xf8   :  { %v4154_v54 = vpop.f32.mrf.mxu1  ;;  %v4156_v9 = vpop.f32.mrf.mxu0 }
  0xf9   :  { %5178 = vst [vmem:[#allocation20_spill] sm:$0xff] %v4154_v54 }
  0xfa   :  { %v4158_v58 = vpop.f32.mrf.mxu1  ;;  %3113 = vmatmul.mubr.msk.bf16.gmra.mxu1 %vm1513_vm2, %v3269_v48  ;;  %v4161_v60 = vpop.f32.mrf.mxu0  ;;  %v3272_v48 = vld [vmem:[%s5149_s2 + $0x38] sm:$0xff]  }
  0xfb   :  { %5179 = vst [vmem:[#allocation21_spill] sm:$0xff] %v4158_v58  ;;  %1651 = vmatprep.mubr.bf16.mxu1 %v5160_v2 }
  0xfc   :  { %v4170_v0 = vpop.f32.mrf.mxu1  ;;  %v4172_v1 = vpop.f32.mrf.mxu0 }
  0xfd   :  { %5180 = vst [vmem:[#allocation22_spill] sm:$0xff] %v4170_v0 }
  0xfe   :  { %v4174_v3 = vpop.f32.mrf.mxu1  ;;  %v4176_v4 = vpop.f32.mrf.mxu0 }
  0xff   :  { %5181 = vst [vmem:[#allocation23_spill] sm:$0xff] %v4174_v3 }
 0x100   :  { %v4181_v14 = vpop.f32.mrf.mxu1  ;;  %v4183_v24 = vpop.f32.mrf.mxu0 }
 0x101   :  { %5182 = vst [vmem:[#allocation24_spill] sm:$0xff] %v4181_v14  ;;  %v3328_v14 = vld [vmem:[%s5156_s9 + $0x84] ss:$8 sps:$4 sm:$0xff]  }
 0x102   :  { %v4185_v25 = vpop.f32.mrf.mxu1  ;;  %3114 = vmatmul.mubr.msk.bf16.gmra.mxu1 %vm1513_vm2, %v3270_v12  ;;  %v4188_v28 = vpop.f32.mrf.mxu0 }
 0x103   :  { %5183 = vst [vmem:[#allocation25_spill] sm:$0xff] %v4185_v25  ;;  %1661 = vmatprep.mubr.bf16.mxu1 %v5160_v2 }
 0x104   :  { %v4197_v39 = vpop.f32.mrf.mxu1  ;;  %v4199_v40 = vpop.f32.mrf.mxu0 }
 0x105   :  { %5184 = vst [vmem:[#allocation26_spill] sm:$0xff] %v4197_v39 }
 0x106   :  { %v4201_v49 = vpop.f32.mrf.mxu1  ;;  %v4203_v52 = vpop.f32.mrf.mxu0 }
 0x107   :  { %5185 = vst [vmem:[#allocation27_spill] sm:$0xff] %v4201_v49 }
 0x108   :  { %v4208_v11 = vpop.f32.mrf.mxu1  ;;  %v4210_v27 = vpop.f32.mrf.mxu0 }
 0x109   :  { %5186 = vst [vmem:[#allocation28_spill] sm:$0xff] %v4208_v11 }
 0x10a   :  { %v4212_v13 = vpop.f32.mrf.mxu1  ;;  %3115 = vmatmul.mubr.msk.bf16.gmra.mxu1 %vm1513_vm2, %v3271_v10  ;;  %v4215_v41 = vpop.f32.mrf.mxu0  ;;  %v3322_v10 = vld [vmem:[%s5156_s9 + $0xa4] ss:$8 sps:$4 sm:$0xff]  }
 0x10b   :  { %5187 = vst [vmem:[#allocation29_spill] sm:$0xff] %v4212_v13  ;;  %1671 = vmatprep.mubr.bf16.mxu1 %v5160_v2  ;;  %2228 = vmatprep.subr.bf16.mxu0 %v3322_v10 }
 0x10c   :  { %v4224_v34 = vpop.f32.mrf.mxu1  ;;  %v4226_v15 = vpop.f32.mrf.mxu0  ;;  %2229 = vmatpush2.bf16.msra.mxu0 %v3320_v38 }
 0x10d   :  { %5188 = vst [vmem:[#allocation30_spill] sm:$0xff] %v4224_v34 }
 0x10e   :  { %v4228_v45 = vpop.f32.mrf.mxu1  ;;  %v4230_v57 = vpop.f32.mrf.mxu0 }
 0x10f   :  { %5189 = vst [vmem:[#allocation31_spill] sm:$0xff] %v4228_v45 }
 0x110   :  { %v4235_v61 = vpop.f32.mrf.mxu1  ;;  %v4237_v62 = vpop.f32.mrf.mxu0 }
 0x111   :  { %5190 = vst [vmem:[#allocation32_spill] sm:$0xff] %v4235_v61  ;;  %5191 = vst [vmem:[#allocation33_spill] sm:$0xff] %v4237_v62 }
 0x112   :  { %v4239_v12 = vpop.f32.mrf.mxu1  ;;  %3116 = vmatmul.mubr.msk.bf16.gmra.mxu1 %vm1513_vm2, %v3272_v48  ;;  %v4242_v29 = vpop.f32.mrf.mxu0 }
 0x113   :  { %5192 = vst [vmem:[#allocation34_spill] sm:$0xff] %v4239_v12  ;;  %1681 = vmatprep.mubr.bf16.mxu1 %v5160_v2  ;;  %v3273_v2 = vld [vmem:[%s5149_s2 + $0x40] sm:$0xff]  }
 0x114   :  { %v4251_v21 = vpop.f32.mrf.mxu1  ;;  %v4253_v32 = vpop.f32.mrf.mxu0 }
 0x115   :  { %5193 = vst [vmem:[#allocation35_spill] sm:$0xff] %v4251_v21 }
 0x116   :  { %v4255_v12 = vpop.f32.mrf.mxu1  ;;  %v4257_v48 = vpop.f32.mrf.mxu0 }
 0x117   :  { %5194 = vst [vmem:[#allocation36_spill] sm:$0xff] %v4255_v12  ;;  %v5197_v12 = vmov 0  }
 0x118   :  { %v4262_v61 = vpop.f32.mrf.mxu1  ;;  %v4264_v45 = vpop.f32.mrf.mxu0 }
 0x119   :  { %5195 = vst [vmem:[#allocation37_spill] sm:$0xff] %v4262_v61  ;;  %5196 = vst [vmem:[#allocation38_spill] sm:$0xff] %v4264_v45  ;;  %v3274_v61 = vld [vmem:[%s5149_s2 + $0x48] sm:$0xff]  }
 0x11a   :  { %v735_v34 = vpop.f32.mrf.mxu1  ;;  %3117 = vmatmul.mubr.msk.bf16.gmra.mxu1 %vm1513_vm2, %v3273_v2  ;;  %v4267_v21 = vpop.f32.mrf.mxu0 }
 0x11b   :  { %v4270_v10 = vadd.f32 %v735_v34, %v4053_v7  ;;  %1691 = vmatprep.mubr.bf16.mxu1 %v5197_v12  ;;  %v3323_v7 = vld [vmem:[%s5156_s9 + $0x90] ss:$8 sps:$4 sm:$0xff]   ;;  %v3325_v34 = vld [vmem:[%s5156_s9 + $0x94] ss:$8 sps:$4 sm:$0xff]  }
 0x11c   :  { %v737_v13 = vpop.f32.mrf.mxu1  ;;  %v4273_v11 = vpop.f32.mrf.mxu0  ;;  %2230 = vmatprep.subr.bf16.mxu0 %v3325_v34 }
 0x11d   :  { %v4276_v49 = vadd.f32 %v737_v13, %v4064_v33  ;;  %2231 = vmatpush2.bf16.msra.mxu0 %v3323_v7 }
 0x11e   :  { %v739_v38 = vpop.f32.mrf.mxu1  ;;  %v4292_v33 = vpop.f32.mrf.mxu0  ;;  %2232 = vmatprep.subr.bf16.mxu0 %v3328_v14 }
 0x11f   :  { %v4282_v2 = vadd.f32 %v739_v38, %v4068_v26 }
 0x120   :  { %v4290_v39 = vpop.f32.mrf.mxu1  ;;  %v4299_v38 = vpop.f32.mrf.mxu0 }
 0x122   :  { %v745_v13 = vpop.f32.mrf.mxu1  ;;  %3118 = vmatmul.mubr.msk.bf16.gmra.mxu1 %vm1513_vm2, %v3274_v61  ;;  %v3326_v61 = vld [vmem:[%s5156_s9 + $0x80] ss:$8 sps:$4 sm:$0xff]   ;;  %s2948_s9 = sshll.u32 %s3353_s1, 4  ;;  %s2949_s9 = int_to_ptr.vmem [resolvable:$true] %s2948_s9 }
 0x123   :  { %v4296_v26 = vadd.f32 %v745_v13, %v4080_v8  ;;  %1701 = vmatprep.mubr.bf16.mxu1 %v5197_v12  ;;  %v3275_v8 = vld [vmem:[%s5149_s2 + $0x50] sm:$0xff]   ;;  %2233 = vmatpush2.bf16.msra.mxu0 %v3326_v61  ;;  %v4316_v13 = vpop.f32.mrf.mxu0  ;;  %v3279_v61 = vld [vmem:[%s5149_s2 + $0x58] sm:$0xff]   ;;  %s3329_s17 = scalar_lea.vmem %s2949_s9, 32  ;;  %p3334_p1 = scmp.lt.s32.totalorder %s2949_s9, %s2949_s9 }
 0x124   :  { %v747_v25 = vpop.f32.mrf.mxu1  ;;  %p3330_p0 = scmp.ne.s32.totalorder %s2949_s9, %s3329_s17  ;;  %p3335_p2 = scmp.lt.s32.totalorder %s3329_s17, %s3329_s17 }
 0x125   :  { %v4305_v3 = vadd.f32 %v747_v25, %v4091_v18  ;;  %v4325_v58 = vpop.f32.mrf.mxu0 }
 0x126   :  { %v749_v7 = vpop.f32.mrf.mxu1  ;;  %p3336_p3 = por %p3335_p2, %p3334_p1 }
 0x127   :  { %v4314_v34 = vadd.f32 %v749_v7, %v4095_v20 }
 0x128   :  { %v4318_v0 = vpop.f32.mrf.mxu1  ;;  %p3337_p4 = pnand %p3336_p3, %p3330_p0 }
 0x12a   :  { %v755_v18 = vpop.f32.mrf.mxu1  ;;  %3119 = vmatmul.mubr.msk.bf16.gmra.mxu1 %vm1513_vm2, %v3275_v8  ;;  %v4336_v8 = vpop.f32.mrf.mxu0 }
 0x12b   :  { %v4322_v25 = vadd.f32 %v755_v18, %v4107_v31  ;;  %1711 = vmatprep.mubr.bf16.mxu1 %v5197_v12 }
 0x12c   :  { %v757_v54 = vpop.f32.mrf.mxu1 }
 0x12d   :  { %v4328_v14 = vadd.f32 %v757_v54, %v4118_v23  ;;  %v4345_v23 = vpop.f32.mrf.mxu0 }
 0x12e   :  { %v759_v20 = vpop.f32.mrf.mxu1 }
 0x12f   :  { %v4334_v7 = vadd.f32 %v759_v20, %v4122_v43  ;;  %v3283_v20 = vld [vmem:[%s5149_s2 + $0x60] sm:$0xff]  }
 0x130   :  { %v4338_v31 = vpop.f32.mrf.mxu1 }
 0x132   :  { %v765_v18 = vpop.f32.mrf.mxu1  ;;  %3120 = vmatmul.mubr.msk.bf16.gmra.mxu1 %vm1513_vm2, %v3279_v61  ;;  %v4356_v61 = vpop.f32.mrf.mxu0 }
 0x133   :  { %v4342_v51 = vadd.f32 %v765_v18, %v4134_v44  ;;  %1721 = vmatprep.mubr.bf16.mxu1 %v5197_v12 }
 0x134   :  { %v767_v54 = vpop.f32.mrf.mxu1 }
 0x135   :  { %v4348_v46 = vadd.f32 %v767_v54, %v4145_v50  ;;  %v4365_v50 = vpop.f32.mrf.mxu0 }
 0x136   :  { %v769_v43 = vpop.f32.mrf.mxu1 }
 0x137   :  { %v4354_v37 = vadd.f32 %v769_v43, %v4149_v47  ;;  %v3287_v43 = vld [vmem:[%s5149_s2 + $0x68] sm:$0xff]  }
 0x138   :  { %v4358_v44 = vpop.f32.mrf.mxu1 }
 0x13a   :  { %v775_v18 = vpop.f32.mrf.mxu1  ;;  %3121 = vmatmul.mubr.msk.bf16.gmra.mxu1 %vm1513_vm2, %v3283_v20  ;;  %v4376_v20 = vpop.f32.mrf.mxu0 }
 0x13b   :  { %v4362_v16 = vadd.f32 %v775_v18, %v4161_v60  ;;  %1731 = vmatprep.mubr.bf16.mxu1 %v5197_v12 }
 0x13c   :  { %v777_v54 = vpop.f32.mrf.mxu1 }
 0x13d   :  { %v4368_v35 = vadd.f32 %v777_v54, %v4172_v1  ;;  %v4385_v1 = vpop.f32.mrf.mxu0 }
 0x13e   :  { %v779_v47 = vpop.f32.mrf.mxu1 }
 0x13f   :  { %v4374_v22 = vadd.f32 %v779_v47, %v4176_v4  ;;  %v3291_v47 = vld [vmem:[%s5149_s2 + $0x70] sm:$0xff]  }
 0x140   :  { %v4378_v60 = vpop.f32.mrf.mxu1 }
 0x142   :  { %v785_v18 = vpop.f32.mrf.mxu1  ;;  %3122 = vmatmul.mubr.msk.bf16.gmra.mxu1 %vm1513_vm2, %v3287_v43  ;;  %v4396_v43 = vpop.f32.mrf.mxu0 }
 0x143   :  { %v4382_v30 = vadd.f32 %v785_v18, %v4188_v28  ;;  %1741 = vmatprep.mubr.bf16.mxu1 %v5197_v12 }
 0x144   :  { %v787_v54 = vpop.f32.mrf.mxu1 }
 0x145   :  { %v4388_v55 = vadd.f32 %v787_v54, %v4199_v40  ;;  %v4405_v40 = vpop.f32.mrf.mxu0 }
 0x146   :  { %v789_v4 = vpop.f32.mrf.mxu1 }
 0x147   :  { %v4394_v19 = vadd.f32 %v789_v4, %v4203_v52  ;;  %v3295_v4 = vld [vmem:[%s5149_s2 + $0x78] sm:$0xff]  }
 0x148   :  { %v4398_v28 = vpop.f32.mrf.mxu1 }
 0x149   :  { %5198 = vst [vmem:[#allocation39_spill] sm:$0xff] %v4394_v19 }
 0x14a   :  { %v795_v18 = vpop.f32.mrf.mxu1  ;;  %3123 = vmatmul.mubr.msk.bf16.gmra.mxu1 %vm1513_vm2, %v3291_v47  ;;  %v4416_v47 = vpop.f32.mrf.mxu0 }
 0x14b   :  { %v4402_v42 = vadd.f32 %v795_v18, %v4215_v41  ;;  %1751 = vmatprep.mubr.bf16.mxu1 %v5197_v12 }
 0x14c   :  { %v797_v54 = vpop.f32.mrf.mxu1 }
 0x14d   :  { %5199 = vst [vmem:[#allocation40_spill] sm:$0xff] %v4402_v42  ;;  %v4408_v6 = vadd.f32 %v797_v54, %v4226_v15  ;;  %v4424_v15 = vpop.f32.mrf.mxu0 }
 0x14e   :  { %v799_v52 = vpop.f32.mrf.mxu1 }
 0x14f   :  { %5200 = vst [vmem:[#allocation41_spill] sm:$0xff] %v4408_v6  ;;  %v4414_v63 = vadd.f32 %v799_v52, %v4230_v57  ;;  %v2588_v57 = vld [vmem:[%s5158_s11 + $0x8] sm:$0xff]  ;;  %v4435_v53 = vpop.f32.mrf.mxu0 }
 0x150   :  { %v4418_v41 = vpop.f32.mrf.mxu1  ;;  %2626 = vperm.xlu1 %3173, %v2588_v57  }
 0x151   :  { %5201 = vst [vmem:[#allocation42_spill] sm:$0xff] %v4414_v63  ;;  %5202 = vst [vmem:[#allocation43_spill] sm:$0xff] %v4418_v41 }
 0x152   :  { %v805_v18 = vpop.f32.mrf.mxu1  ;;  %3124 = vmatmul.mubr.msk.bf16.gmra.mxu1 %vm1513_vm2, %v3295_v4 }
 0x153   :  { %v4422_v12 = vadd.f32 %v805_v18, %v4242_v29  ;;  %v4444_v18 = vpop.f32.mrf.mxu0 }
 0x154   :  { %v807_v54 = vpop.f32.mrf.mxu1 }
 0x155   :  { %5203 = vst [vmem:[#allocation44_spill] sm:$0xff] %v4422_v12  ;;  %v4427_v59 = vadd.f32 %v807_v54, %v4253_v32  ;;  %v2589_v32 = vld [vmem:[%s5158_s11 + $0x10] sm:$0xff] }
 0x156   :  { %v809_v17 = vpop.f32.mrf.mxu1  ;;  %2631 = vperm.xlu1 %3173, %v2589_v32   ;;  %v2591_v32 = vld [vmem:[%s5158_s11 + $0x20] sm:$0xff] }
 0x157   :  { %5204 = vst [vmem:[#allocation45_spill] sm:$0xff] %v4427_v59  ;;  %v4433_v52 = vadd.f32 %v809_v17, %v4257_v48  ;;  %v2590_v17 = vld [vmem:[%s5158_s11 + $0x18] sm:$0xff]  ;;  %v4453_v48 = vpop.f32.mrf.mxu0 }
 0x158   :  { %v4437_v4 = vpop.f32.mrf.mxu1 }
 0x159   :  { %5205 = vst [vmem:[#allocation46_spill] sm:$0xff] %v4433_v52  ;;  %5206 = vst [vmem:[#allocation47_spill] sm:$0xff] %v4437_v4  ;;  %v4462_v52 = vpop.f32.mrf.mxu0 }
 0x15a   :  { %v4439_v29 = vpop.f32.mrf.mxu1  ;;  %2636 = vperm.xlu1 %3173, %v2590_v17   ;;  %v2593_v17 = vld [vmem:[%s5158_s11 + $0x30] sm:$0xff] }
 0x15b   :  { %5207 = vst [vmem:[#allocation48_spill] sm:$0xff] %v4439_v29  ;;  %v4471_v4 = vpop.f32.mrf.mxu0 }
 0x15c   :  { %v4446_v54 = vpop.f32.mrf.mxu1 }
 0x15d   :  { %5208 = vst [vmem:[#allocation49_spill] sm:$0xff] %v4446_v54 }
 0x15e   :  { %v4448_v45 = vpop.f32.mrf.mxu1  ;;  %2641 = vperm.xlu1 %3173, %v2591_v32  }
 0x15f   :  { %5209 = vst [vmem:[#allocation50_spill] sm:$0xff] %v4448_v45 }
 0x160   :  { %v4455_v57 = vpop.f32.mrf.mxu1 }
 0x161   :  { %5210 = vst [vmem:[#allocation51_spill] sm:$0xff] %v4455_v57 }
 0x162   :  { %v4457_v29 = vpop.f32.mrf.mxu1  ;;  %2651 = vperm.xlu1 %3173, %v2593_v17   ;;  %v2592_v17 = vld [vmem:[%s5158_s11 + $0x28] sm:$0xff] }
 0x163   :  { %5211 = vst [vmem:[#allocation52_spill] sm:$0xff] %v4457_v29  ;;  %v2587_v29 = vld [vmem:[%s5158_s11] sm:$0xff] }
 0x164   :  { %v4464_v54 = vpop.f32.mrf.mxu1  ;;  %2621 = vperm.xlu0 %3172, %v2587_v29   ;;  %v2597_v29 = vld [vmem:[%s5158_s11 + $0x50] sm:$0xff] }
 0x165   :  { %5212 = vst [vmem:[#allocation53_spill] sm:$0xff] %v4464_v54  ;;  %v4483_v54 = vpop.f32.mrf.mxu0 }
 0x166   :  { %v4466_v45 = vpop.f32.mrf.mxu1 }
 0x167   :  { %5213 = vst [vmem:[#allocation54_spill] sm:$0xff] %v4466_v45  ;;  %v2595_v45 = vld [vmem:[%s5158_s11 + $0x40] sm:$0xff] }
 0x168   :  { %v4473_v57 = vpop.f32.mrf.mxu1  ;;  %2661 = vperm.xlu1 %3173, %v2595_v45   ;;  %2646 = vperm.xlu0 %3172, %v2592_v17   ;;  %v2594_v45 = vld [vmem:[%s5158_s11 + $0x38] sm:$0xff]  ;;  %v2599_v17 = vld [vmem:[%s5158_s11 + $0x60] sm:$0xff] }
 0x169   :  { %5214 = vst [vmem:[#allocation55_spill] sm:$0xff] %v4473_v57 }
 0x16a   :  { %v4478_v32 = vpop.f32.mrf.mxu1 }
 0x16b   :  { %5215 = vst [vmem:[#allocation56_spill] sm:$0xff] %v4478_v32  ;;  %v4495_v32 = vpop.f32.mrf.mxu0 }
 0x16c   :  { %v4485_v59 = vpop.f32.mrf.mxu1  ;;  %2671 = vperm.xlu1 %3173, %v2597_v29   ;;  %5218 = vst [vmem:[#allocation59_spill] sm:$0xff] %v4495_v32  ;;  %2656 = vperm.xlu0 %3172, %v2594_v45   ;;  %v2596_v29 = vld [vmem:[%s5158_s11 + $0x48] sm:$0xff]  ;;  %v2601_v45 = vld [vmem:[%s5158_s11 + $0x70] sm:$0xff] }
 0x16d   :  { %5216 = vst [vmem:[#allocation57_spill] sm:$0xff] %v4485_v59 }
 0x16e   :  { %v4490_v57 = vpop.f32.mrf.mxu1 }
 0x16f   :  { %5217 = vst [vmem:[#allocation58_spill] sm:$0xff] %v4490_v57  ;;  %v4507_v57 = vpop.f32.mrf.mxu0 }
 0x170   :  { %v4497_v12 = vpop.f32.mrf.mxu1  ;;  %2681 = vperm.xlu1 %3173, %v2599_v17   ;;  %5221 = vst [vmem:[#allocation62_spill] sm:$0xff] %v4507_v57  ;;  %2666 = vperm.xlu0 %3172, %v2596_v29   ;;  %v2598_v17 = vld [vmem:[%s5158_s11 + $0x58] sm:$0xff]  ;;  %v2603_v29 = vld [vmem:[%s5158_s11 + $0x80] sm:$0xff] }
 0x171   :  { %5219 = vst [vmem:[#allocation60_spill] sm:$0xff] %v4497_v12 }
 0x172   :  { %v4502_v59 = vpop.f32.mrf.mxu1 }
 0x173   :  { %5220 = vst [vmem:[#allocation61_spill] sm:$0xff] %v4502_v59  ;;  %v4519_v59 = vpop.f32.mrf.mxu0 }
 0x174   :  { %v4509_v63 = vpop.f32.mrf.mxu1  ;;  %2691 = vperm.xlu1 %3173, %v2601_v45   ;;  %5224 = vst [vmem:[#allocation65_spill] sm:$0xff] %v4519_v59  ;;  %2676 = vperm.xlu0 %3172, %v2598_v17   ;;  %v2600_v45 = vld [vmem:[%s5158_s11 + $0x68] sm:$0xff]  ;;  %v2605_v17 = vld [vmem:[%s5158_s11 + $0x90] sm:$0xff] }
 0x175   :  { %5222 = vst [vmem:[#allocation63_spill] sm:$0xff] %v4509_v63 }
 0x176   :  { %v4514_v12 = vpop.f32.mrf.mxu1 }
 0x177   :  { %5223 = vst [vmem:[#allocation64_spill] sm:$0xff] %v4514_v12  ;;  %v4531_v12 = vpop.f32.mrf.mxu0 }
 0x178   :  { %v4521_v41 = vpop.f32.mrf.mxu1  ;;  %2701 = vperm.xlu1 %3173, %v2603_v29   ;;  %5227 = vst [vmem:[#allocation68_spill] sm:$0xff] %v4531_v12  ;;  %2686 = vperm.xlu0 %3172, %v2600_v45   ;;  %v2602_v29 = vld [vmem:[%s5158_s11 + $0x78] sm:$0xff]  ;;  %v2607_v45 = vld [vmem:[%s5158_s11 + $0xa0] sm:$0xff] }
 0x179   :  { %5225 = vst [vmem:[#allocation66_spill] sm:$0xff] %v4521_v41 }
 0x17a   :  { %v4526_v63 = vpop.f32.mrf.mxu1 }
 0x17b   :  { %5226 = vst [vmem:[#allocation67_spill] sm:$0xff] %v4526_v63  ;;  %v4543_v63 = vpop.f32.mrf.mxu0 }
 0x17c   :  { %v4533_v62 = vpop.f32.mrf.mxu1  ;;  %2711 = vperm.xlu1 %3173, %v2605_v17   ;;  %5230 = vst [vmem:[#allocation71_spill] sm:$0xff] %v4543_v63  ;;  %2696 = vperm.xlu0 %3172, %v2602_v29   ;;  %v2604_v17 = vld [vmem:[%s5158_s11 + $0x88] sm:$0xff]  ;;  %v2609_v29 = vld [vmem:[%s5158_s11 + $0xb0] sm:$0xff] }
 0x17d   :  { %5228 = vst [vmem:[#allocation69_spill] sm:$0xff] %v4533_v62 }
 0x17e   :  { %v4538_v41 = vpop.f32.mrf.mxu1 }
 0x17f   :  { %5229 = vst [vmem:[#allocation70_spill] sm:$0xff] %v4538_v41  ;;  %v4555_v41 = vpop.f32.mrf.mxu0 }
 0x180   :  { %v4545_v6 = vpop.f32.mrf.mxu1  ;;  %2721 = vperm.xlu1 %3173, %v2607_v45   ;;  %5233 = vst [vmem:[#allocation74_spill] sm:$0xff] %v4555_v41  ;;  %2706 = vperm.xlu0 %3172, %v2604_v17   ;;  %v2606_v45 = vld [vmem:[%s5158_s11 + $0x98] sm:$0xff]  ;;  %v2611_v17 = vld [vmem:[%s5158_s11 + $0xc0] sm:$0xff] }
 0x181   :  { %5231 = vst [vmem:[#allocation72_spill] sm:$0xff] %v4545_v6 }
 0x182   :  { %v4550_v62 = vpop.f32.mrf.mxu1 }
 0x183   :  { %5232 = vst [vmem:[#allocation73_spill] sm:$0xff] %v4550_v62  ;;  %v4567_v62 = vpop.f32.mrf.mxu0 }
 0x184   :  { %v4557_v12 = vpop.f32.mrf.mxu1  ;;  %2731 = vperm.xlu1 %3173, %v2609_v29   ;;  %5236 = vst [vmem:[#allocation77_spill] sm:$0xff] %v4567_v62  ;;  %2716 = vperm.xlu0 %3172, %v2606_v45   ;;  %v2608_v29 = vld [vmem:[%s5158_s11 + $0xa8] sm:$0xff]  ;;  %v2613_v45 = vld [vmem:[%s5158_s11 + $0xd0] sm:$0xff] }
 0x185   :  { %5234 = vst [vmem:[#allocation75_spill] sm:$0xff] %v4557_v12 }
 0x186   :  { %v4562_v6 = vpop.f32.mrf.mxu1 }
 0x187   :  { %5235 = vst [vmem:[#allocation76_spill] sm:$0xff] %v4562_v6  ;;  %v4579_v6 = vpop.f32.mrf.mxu0 }
 0x188   :  { %v4569_v63 = vpop.f32.mrf.mxu1  ;;  %2741 = vperm.xlu1 %3173, %v2611_v17   ;;  %5239 = vst [vmem:[#allocation80_spill] sm:$0xff] %v4579_v6  ;;  %2726 = vperm.xlu0 %3172, %v2608_v29   ;;  %v2615_v29 = vld [vmem:[%s5158_s11 + $0xe0] sm:$0xff] }
 0x189   :  { %5237 = vst [vmem:[#allocation78_spill] sm:$0xff] %v4569_v63  ;;  %v4591_v62 = vpop.f32.mrf.mxu0 }
 0x18a   :  { %v4574_v12 = vpop.f32.mrf.mxu1  ;;  %5242 = vst [vmem:[#allocation83_spill] sm:$0xff] %v4591_v62 }
 0x18b   :  { %5238 = vst [vmem:[#allocation79_spill] sm:$0xff] %v4574_v12  ;;  %v5162_v12 = vlaneseq }
 0x18c   :  { %v4581_v41 = vpop.f32.mrf.mxu1  ;;  %2751 = vperm.xlu1 %3173, %v2613_v45   ;;  %v4606_v45 = vpop.f32.mrf.mxu0 }
 0x18d   :  { %5240 = vst [vmem:[#allocation81_spill] sm:$0xff] %v4581_v41  ;;  %v2610_v41 = vld [vmem:[%s5158_s11 + $0xb8] sm:$0xff]  ;;  %5245 = vst [vmem:[#allocation86_spill] sm:$0xff] %v4606_v45 }
 0x18e   :  { %v4586_v63 = vpop.f32.mrf.mxu1  ;;  %2736 = vperm.xlu0 %3172, %v2610_v41   ;;  %v4616_v59 = vpop.f32.mrf.mxu0 }
 0x18f   :  { %5241 = vst [vmem:[#allocation82_spill] sm:$0xff] %v4586_v63  ;;  %v4604_v63 = vshrl.u32 %v5162_v12, 7  ;;  %5248 = vst [vmem:[#allocation89_spill] sm:$0xff] %v4616_v59  ;;  %v2614_v12 = vld [vmem:[%s5158_s11 + $0xd8] sm:$0xff] }
 0x190   :  { %v4593_v17 = vpop.f32.mrf.mxu1  ;;  %2761 = vperm.xlu1 %3173, %v2615_v29   ;;  %v1826_v29 = vld [vmem:[%s5155_s8] sm:$0x3]  ;;  %v4637_v32 = vpop.f32.mrf.mxu0 }
 0x191   :  { %5243 = vst [vmem:[#allocation84_spill] sm:$0xff] %v4593_v17  ;;  %v2612_v17 = vld [vmem:[%s5158_s11 + $0xc8] sm:$0xff]  ;;  %v5250_v45 = vsub.s32 0, %v4604_v63  ;;  %5251 = vst [vmem:[#allocation91_spill] sm:$0xff] %v4637_v32  ;;  %v1323_v32 = vadd.f32 %v4316_v13, %v4296_v26  ;;  %v1325_v26 = vadd.f32 %v4336_v8, %v4314_v34  ;;  %v1327_v34 = vadd.f32 %v4356_v61, %v4322_v25 }
 0x192   :  { %v4598_v6 = vpop.f32.mrf.mxu1  ;;  %2746 = vperm.xlu0 %3172, %v2612_v17   ;;  %v1834_v17 = vsub.s32 1, %v4604_v63  ;;  %v1329_v25 = vadd.f32 %v4376_v20, %v4334_v7  ;;  %v1331_v7 = vadd.f32 %v4396_v43, %v4342_v51  ;;  %v1333_v51 = vadd.f32 %v4416_v47, %v4354_v37 }
 0x193   :  { %5244 = vst [vmem:[#allocation85_spill] sm:$0xff] %v4598_v6  ;;  %v1320_v6 = vadd.f32 %v4273_v11, %v4276_v49  ;;  %v4635_v57 = vrot.slane %v1826_v29, %v5250_v45  ;;  %v4650_v45 = vpop.f32.mrf.mxu0  ;;  %v1335_v37 = vadd.f32 %v4435_v53, %v4362_v16  ;;  %v1337_v53 = vadd.f32 %v4453_v48, %v4374_v22 }
 0x194   :  { %v4608_v62 = vpop.f32.mrf.mxu1  ;;  %v4646_v49 = vrot.slane %v1826_v29, %v1834_v17  ;;  %v1339_v22 = vadd.f32 %v4471_v4, %v4382_v30  ;;  %v5252_v30 = vld [vmem:[#allocation39_spill] sm:$0xff] }
 0x195   :  { %5246 = vst [vmem:[#allocation87_spill] sm:$0xff] %v4608_v62  ;;  %v1319_v62 = vadd.f32 %v4267_v21, %v4270_v10  ;;  %v2616_v21 = vld [vmem:[%s5158_s11 + $0xe8] sm:$0xff]  ;;  %v1321_v10 = vadd.f32 %v4292_v33, %v4282_v2  ;;  %v1324_v33 = vadd.f32 %v4325_v58, %v4305_v3  ;;  %v4663_v13 = vpop.f32.mrf.mxu0  ;;  %v5253_v4 = vld [vmem:[#allocation59_spill] sm:$0xff] }
 0x196   :  { %v4613_v41 = vpop.f32.mrf.mxu1  ;;  %2756 = vperm.xlu0 %3172, %v2614_v12  }
 0x197   :  { %5247 = vst [vmem:[#allocation88_spill] sm:$0xff] %v4613_v41 }
 0x198   :  { %v4618_v42 = vpop.f32.mrf.mxu1 }
 0x199   :  { %5249 = vst [vmem:[#allocation90_spill] sm:$0xff] %v4618_v42  ;;  %v742_v42 = vadd.f32 %v4290_v39, %v4075_v5 }
 0x19a   :  { %v1603_v41 = vpop.f32.mrf.mxu1  ;;  %2766 = vperm.xlu0 %3172, %v2616_v21  }
 0x19b   :  { %v1762_v59 = vadd.f32 %v1603_v41, %v1319_v62  ;;  %v1322_v39 = vadd.f32 %v4299_v38, %v742_v42  ;;  %v752_v42 = vadd.f32 %v4318_v0, %v4102_v56 }
 0x19c   :  { %v1605_v19 = vpop.f32.mrf.mxu1 }
 0x19d   :  { %v1763_v12 = vadd.f32 %v1605_v19, %v1320_v6  ;;  %v1838_v11 = vadd.f32 %v4635_v57, %v1762_v59  ;;  %v1326_v3 = vadd.f32 %v4345_v23, %v752_v42  ;;  %v762_v23 = vadd.f32 %v4338_v31, %v4129_v36 }
 0x19e   :  { %v1607_v5 = vpop.f32.mrf.mxu1 }
 0x19f   :  { %v1764_v62 = vadd.f32 %v1607_v5, %v1321_v10  ;;  %v1839_v2 = vadd.f32 %v4646_v49, %v1763_v12  ;;  %v1902_v59 = vmax.f32 %v1838_v11, 0.0  ;;  %v1330_v36 = vadd.f32 %v4385_v1, %v762_v23 }
 0x1a0   :  { %v1609_v41 = vpop.f32.mrf.mxu1  ;;  %v772_v1 = vadd.f32 %v4358_v44, %v4156_v9 }
 0x1a1   :  { %v1840_v6 = vadd.f32 %v4635_v57, %v1764_v62  ;;  %v1765_v19 = vadd.f32 %v1609_v41, %v1322_v39  ;;  %v1903_v5 = vmax.f32 %v1839_v2, 0.0 }
 0x1a2   :  { %v1613_v38 = vpop.f32.mrf.mxu1  ;;  %v1334_v9 = vadd.f32 %v4424_v15, %v772_v1  ;;  %v782_v15 = vadd.f32 %v4378_v60, %v4183_v24 }
 0x1a3   :  { %v1904_v29 = vmax.f32 %v1840_v6, 0.0  ;;  %v1841_v21 = vadd.f32 %v4646_v49, %v1765_v19  ;;  %v1766_v10 = vadd.f32 %v1613_v38, %v1323_v32  ;;  %v4667_v6 = vpop.f32.mrf.mxu0 }
 0x1a4   :  { %v1615_v12 = vpop.f32.mrf.mxu1  ;;  %v1338_v24 = vadd.f32 %v4462_v52, %v782_v15  ;;  %v792_v52 = vadd.f32 %v4398_v28, %v4210_v27 }
 0x1a5   :  { %v1966_v39 = vpack.c.bf16 %v1904_v29, %v1902_v59  ;;  %v1905_v62 = vmax.f32 %v1841_v21, 0.0  ;;  %v1767_v41 = vadd.f32 %v1615_v12, %v1324_v33  ;;  %v1842_v56 = vadd.f32 %v4635_v57, %v1766_v10  ;;  %v4680_v61 = vpop.f32.mrf.mxu0 }
 0x1a6   :  { %v1617_v58 = vpop.f32.mrf.mxu1  ;;  %v1328_v33 = vadd.f32 %v4365_v50, %v4328_v14 }
 0x1a7   :  { %v1768_v0 = vadd.f32 %v1617_v58, %v1325_v26  ;;  %v1967_v11 = vpack.c.bf16 %v1905_v62, %v1903_v5  ;;  %v1843_v8 = vadd.f32 %v4646_v49, %v1767_v41  ;;  %v1906_v38 = vmax.f32 %v1842_v56, 0.0  ;;  %v4684_v41 = vpop.f32.mrf.mxu0 }
 0x1a8   :  { %v1619_v32 = vpop.f32.mrf.mxu1 }
 0x1a9   :  { %v1844_v2 = vadd.f32 %v4635_v57, %v1768_v0  ;;  %v1769_v19 = vadd.f32 %v1619_v32, %v1326_v3  ;;  %2234 = vmatprep.mubr.bf16.mxu0 %v1967_v11  ;;  %v1907_v26 = vmax.f32 %v1843_v8, 0.0  ;;  %v1332_v0 = vadd.f32 %v4405_v40, %v4348_v46  ;;  %v4697_v43 = vpop.f32.mrf.mxu0 }
 0x1aa   :  { %v1623_v42 = vpop.f32.mrf.mxu1  ;;  %2235 = vmatmul.mubr.bf16.vlgmr.msra.gmra.mxu0 %v1966_v39 }
 0x1ab   :  { %v1908_v59 = vmax.f32 %v1844_v2, 0.0  ;;  %v1845_v29 = vadd.f32 %v4646_v49, %v1769_v19  ;;  %v1770_v21 = vadd.f32 %v1623_v42, %v1327_v34 }
 0x1ac   :  { %v1625_v10 = vpop.f32.mrf.mxu1 }
 0x1ad   :  { %v1909_v12 = vmax.f32 %v1845_v29, 0.0  ;;  %v1771_v5 = vadd.f32 %v1625_v10, %v1328_v33  ;;  %v1968_v14 = vpack.c.bf16 %v1908_v59, %v1906_v38  ;;  %v1846_v31 = vadd.f32 %v4635_v57, %v1770_v21  ;;  %v4701_v29 = vpop.f32.mrf.mxu0 }
 0x1ae   :  { %v1627_v50 = vpop.f32.mrf.mxu1 }
 0x1af   :  { %v1772_v39 = vadd.f32 %v1627_v50, %v1329_v25  ;;  %v1969_v62 = vpack.c.bf16 %v1909_v12, %v1907_v26  ;;  %v1847_v20 = vadd.f32 %v4646_v49, %v1771_v5  ;;  %v1910_v32 = vmax.f32 %v1846_v31, 0.0  ;;  %v4714_v16 = vpop.f32.mrf.mxu0 }
 0x1b0   :  { %v1629_v58 = vpop.f32.mrf.mxu1  ;;  %v1336_v26 = vadd.f32 %v4444_v18, %v4368_v35 }
 0x1b1   :  { %v1848_v3 = vadd.f32 %v4635_v57, %v1772_v39  ;;  %v1773_v56 = vadd.f32 %v1629_v58, %v1330_v36  ;;  %2244 = vmatprep.mubr.bf16.mxu0 %v1969_v62  ;;  %v1911_v33 = vmax.f32 %v1847_v20, 0.0 }
 0x1b2   :  { %v1633_v11 = vpop.f32.mrf.mxu1  ;;  %2245 = vmatmul.mubr.bf16.gmra.mxu0 %v1968_v14 }
 0x1b3   :  { %v1912_v34 = vmax.f32 %v1848_v3, 0.0  ;;  %v1849_v8 = vadd.f32 %v4646_v49, %v1773_v56  ;;  %v1774_v2 = vadd.f32 %v1633_v11, %v1331_v7  ;;  %v4718_v3 = vpop.f32.mrf.mxu0  ;;  %v1340_v11 = vadd.f32 %v4483_v54, %v4388_v55 }
 0x1b4   :  { %v1635_v19 = vpop.f32.mrf.mxu1 }
 0x1b5   :  { %v1913_v23 = vmax.f32 %v1849_v8, 0.0  ;;  %v1775_v42 = vadd.f32 %v1635_v19, %v1332_v0  ;;  %v1970_v46 = vpack.c.bf16 %v1912_v34, %v1910_v32  ;;  %v1850_v44 = vadd.f32 %v4635_v57, %v1774_v2 }
 0x1b6   :  { %v1637_v40 = vpop.f32.mrf.mxu1  ;;  %v1341_v19 = vadd.f32 %v5253_v4, %v5252_v30  ;;  %v5264_v30 = vld [vmem:[#allocation44_spill] sm:$0xff]  ;;  %v5265_v4 = vld [vmem:[#allocation77_spill] sm:$0xff] }
 0x1b7   :  { %v1776_v38 = vadd.f32 %v1637_v40, %v1333_v51  ;;  %v1971_v59 = vpack.c.bf16 %v1913_v23, %v1911_v33  ;;  %v1851_v47 = vadd.f32 %v4646_v49, %v1775_v42  ;;  %v1914_v5 = vmax.f32 %v1850_v44, 0.0  ;;  %v4731_v33 = vpop.f32.mrf.mxu0 }
 0x1b8   :  { %v1639_v21 = vpop.f32.mrf.mxu1 }
 0x1b9   :  { %v1852_v25 = vadd.f32 %v4635_v57, %v1776_v38  ;;  %v1777_v10 = vadd.f32 %v1639_v21, %v1334_v9  ;;  %2254 = vmatprep.mubr.bf16.mxu0 %v1971_v59  ;;  %v1915_v39 = vmax.f32 %v1851_v47, 0.0  ;;  %v5254_v9 = vld [vmem:[#allocation62_spill] sm:$0xff]  ;;  %v4735_v59 = vpop.f32.mrf.mxu0  ;;  %v5256_v47 = vld [vmem:[#allocation65_spill] sm:$0xff] }
 0x1ba   :  { %v1643_v12 = vpop.f32.mrf.mxu1  ;;  %2255 = vmatmul.mubr.bf16.gmra.mxu0 %v1970_v46  ;;  %v1342_v27 = vadd.f32 %v5254_v9, %v792_v52  ;;  %v5268_v9 = vld [vmem:[#allocation38_spill] sm:$0xff] }
 0x1bb   :  { %v1916_v14 = vmax.f32 %v1852_v25, 0.0  ;;  %v1853_v50 = vadd.f32 %v4646_v49, %v1777_v10  ;;  %v1778_v36 = vadd.f32 %v1643_v12, %v1335_v37  ;;  %v5255_v37 = vld [vmem:[#allocation40_spill] sm:$0xff]  ;;  %v5257_v12 = vld [vmem:[#allocation41_spill] sm:$0xff] }
 0x1bc   :  { %v1645_v31 = vpop.f32.mrf.mxu1  ;;  %v1343_v25 = vadd.f32 %v5256_v47, %v5255_v37 }
 0x1bd   :  { %v1917_v62 = vmax.f32 %v1853_v50, 0.0  ;;  %v1779_v58 = vadd.f32 %v1645_v31, %v1336_v26  ;;  %v1972_v35 = vpack.c.bf16 %v1916_v14, %v1914_v5  ;;  %v1854_v60 = vadd.f32 %v4635_v57, %v1778_v36  ;;  %v5258_v5 = vld [vmem:[#allocation68_spill] sm:$0xff]  ;;  %v5259_v50 = vld [vmem:[#allocation33_spill] sm:$0xff]  ;;  %v5260_v36 = vld [vmem:[#allocation43_spill] sm:$0xff] }
 0x1be   :  { %v1647_v18 = vpop.f32.mrf.mxu1  ;;  %v1344_v14 = vadd.f32 %v5258_v5, %v5257_v12  ;;  %v5273_v12 = vld [vmem:[#allocation48_spill] sm:$0xff] }
 0x1bf   :  { %v1780_v7 = vadd.f32 %v1647_v18, %v1337_v53  ;;  %v1973_v20 = vpack.c.bf16 %v1917_v62, %v1915_v39  ;;  %v1855_v48 = vadd.f32 %v4646_v49, %v1779_v58  ;;  %v1918_v34 = vmax.f32 %v1854_v60, 0.0  ;;  %v5261_v18 = vld [vmem:[#allocation42_spill] sm:$0xff] }
 0x1c0   :  { %v1649_v56 = vpop.f32.mrf.mxu1  ;;  %v802_v53 = vadd.f32 %v5260_v36, %v5259_v50 }
 0x1c1   :  { %v1856_v0 = vadd.f32 %v4635_v57, %v1780_v7  ;;  %v1781_v1 = vadd.f32 %v1649_v56, %v1338_v24  ;;  %2264 = vmatprep.mubr.bf16.mxu0 %v1973_v20  ;;  %v1919_v42 = vmax.f32 %v1855_v48, 0.0  ;;  %v5262_v24 = vld [vmem:[#allocation71_spill] sm:$0xff]  ;;  %v4748_v7 = vpop.f32.mrf.mxu0 }
 0x1c2   :  { %v1653_v32 = vpop.f32.mrf.mxu1  ;;  %2265 = vmatmul.mubr.bf16.gmra.mxu0 %v1972_v35  ;;  %v1345_v60 = vadd.f32 %v5262_v24, %v5261_v18  ;;  %v5276_v24 = vld [vmem:[#allocation86_spill] sm:$0xff] }
 0x1c3   :  { %v1920_v8 = vmax.f32 %v1856_v0, 0.0  ;;  %v1857_v2 = vadd.f32 %v4646_v49, %v1781_v1  ;;  %v1782_v51 = vadd.f32 %v1653_v32, %v1339_v22 }
 0x1c4   :  { %v1655_v23 = vpop.f32.mrf.mxu1 }
 0x1c5   :  { %v1974_v46 = vpack.c.bf16 %v1920_v8, %v1918_v34  ;;  %v1921_v40 = vmax.f32 %v1857_v2, 0.0  ;;  %v1783_v55 = vadd.f32 %v1655_v23, %v1340_v11  ;;  %v1858_v28 = vadd.f32 %v4635_v57, %v1782_v51  ;;  %v5263_v11 = vld [vmem:[#allocation74_spill] sm:$0xff]  ;;  %v4752_v2 = vpop.f32.mrf.mxu0 }
 0x1c6   :  { %v1657_v54 = vpop.f32.mrf.mxu1  ;;  %v1346_v52 = vadd.f32 %v5263_v11, %v802_v53 }
 0x1c7   :  { %v1784_v44 = vadd.f32 %v1657_v54, %v1341_v19  ;;  %v1975_v38 = vpack.c.bf16 %v1921_v40, %v1919_v42  ;;  %v1859_v10 = vadd.f32 %v4646_v49, %v1783_v55  ;;  %v1922_v39 = vmax.f32 %v1858_v28, 0.0  ;;  %v5266_v40 = vld [vmem:[#allocation45_spill] sm:$0xff]  ;;  %v5267_v55 = vld [vmem:[#allocation80_spill] sm:$0xff] }
 0x1c8   :  { %v1659_v21 = vpop.f32.mrf.mxu1  ;;  %v1347_v19 = vadd.f32 %v5265_v4, %v5264_v30  ;;  %v1348_v54 = vadd.f32 %v5267_v55, %v5266_v40  ;;  %v5280_v4 = vld [vmem:[#allocation91_spill] sm:$0xff] }
 0x1c9   :  { %v1860_v26 = vadd.f32 %v4635_v57, %v1784_v44  ;;  %v1785_v15 = vadd.f32 %v1659_v21, %v1342_v27  ;;  %2274 = vmatprep.mubr.bf16.mxu0 %v1975_v38  ;;  %v1923_v56 = vmax.f32 %v1859_v10, 0.0  ;;  %v5269_v27 = vld [vmem:[#allocation47_spill] sm:$0xff] }
 0x1ca   :  { %v1663_v31 = vpop.f32.mrf.mxu1  ;;  %2275 = vmatmul.mubr.bf16.gmra.mxu0 %v1974_v46  ;;  %v812_v28 = vadd.f32 %v5269_v27, %v5268_v9  ;;  %v5271_v10 = vld [vmem:[#allocation83_spill] sm:$0xff] }
 0x1cb   :  { %v1924_v62 = vmax.f32 %v1860_v26, 0.0  ;;  %v1861_v58 = vadd.f32 %v4646_v49, %v1785_v15  ;;  %v1786_v35 = vadd.f32 %v1663_v31, %v1343_v25  ;;  %v5270_v25 = vld [vmem:[#allocation46_spill] sm:$0xff]  ;;  %v5272_v15 = vld [vmem:[#allocation5_spill] sm:$0xff] }
 0x1cc   :  { %v1665_v20 = vpop.f32.mrf.mxu1  ;;  %v1349_v26 = vadd.f32 %v5271_v10, %v5270_v25  ;;  %v816_v5 = vadd.f32 %v5273_v12, %v5272_v15  ;;  %v5285_v12 = vld [vmem:[#allocation10_spill] sm:$0xff] }
 0x1cd   :  { %v1976_v22 = vpack.c.bf16 %v1924_v62, %v1922_v39  ;;  %v1925_v48 = vmax.f32 %v1861_v58, 0.0  ;;  %v1787_v0 = vadd.f32 %v1665_v20, %v1344_v14  ;;  %v1862_v32 = vadd.f32 %v4635_v57, %v1786_v35  ;;  %v4767_v14 = vpop.f32.mrf.mxu0  ;;  %v5274_v62 = vld [vmem:[#allocation6_spill] sm:$0xff]  ;;  %v5275_v58 = vld [vmem:[#allocation49_spill] sm:$0xff] }
 0x1ce   :  { %v1667_v1 = vpop.f32.mrf.mxu1  ;;  %v818_v35 = vadd.f32 %v5275_v58, %v5274_v62  ;;  %v5287_v62 = vld [vmem:[#allocation11_spill] sm:$0xff]  ;;  %v5288_v58 = vld [vmem:[#allocation54_spill] sm:$0xff] }
 0x1cf   :  { %v1788_v34 = vadd.f32 %v1667_v1, %v1345_v60  ;;  %v1977_v8 = vpack.c.bf16 %v1925_v48, %v1923_v56  ;;  %v1863_v23 = vadd.f32 %v4646_v49, %v1787_v0  ;;  %v1926_v38 = vmax.f32 %v1862_v32, 0.0  ;;  %v5277_v48 = vld [vmem:[#allocation7_spill] sm:$0xff]  ;;  %v5278_v0 = vld [vmem:[#allocation50_spill] sm:$0xff]  ;;  %v4775_v11 = vpop.f32.mrf.mxu0  ;;  %v5279_v32 = vld [vmem:[#allocation89_spill] sm:$0xff] }
 0x1d0   :  { %v1669_v51 = vpop.f32.mrf.mxu1  ;;  %v1350_v60 = vadd.f32 %v5276_v24, %v812_v28  ;;  %v820_v1 = vadd.f32 %v5278_v0, %v5277_v48  ;;  %v5289_v48 = vld [vmem:[#allocation12_spill] sm:$0xff]  ;;  %v5290_v0 = vld [vmem:[#allocation55_spill] sm:$0xff] }
 0x1d1   :  { %v1864_v42 = vadd.f32 %v4635_v57, %v1788_v34  ;;  %v1789_v46 = vadd.f32 %v1669_v51, %v1346_v52  ;;  %2284 = vmatprep.mubr.bf16.mxu0 %v1977_v8  ;;  %v1927_v36 = vmax.f32 %v1863_v23, 0.0  ;;  %v1351_v34 = vadd.f32 %v5279_v32, %v816_v5  ;;  %v5281_v23 = vld [vmem:[#allocation8_spill] sm:$0xff]  ;;  %v5286_v5 = vld [vmem:[#allocation53_spill] sm:$0xff] }
 0x1d2   :  { %v1673_v44 = vpop.f32.mrf.mxu1  ;;  %2285 = vmatmul.mubr.bf16.gmra.mxu0 %v1976_v22  ;;  %v1353_v28 = vadd.f32 %v4650_v45, %v820_v1  ;;  %v832_v1 = vadd.f32 %v5290_v0, %v5289_v48 }
 0x1d3   :  { %v1928_v21 = vmax.f32 %v1864_v42, 0.0  ;;  %v1865_v37 = vadd.f32 %v4646_v49, %v1789_v46  ;;  %v1790_v47 = vadd.f32 %v1673_v44, %v1347_v19  ;;  %v1352_v19 = vadd.f32 %v5280_v4, %v818_v35  ;;  %v5282_v42 = vld [vmem:[#allocation51_spill] sm:$0xff]  ;;  %v5283_v44 = vld [vmem:[#allocation9_spill] sm:$0xff]  ;;  %v5292_v4 = vld [vmem:[#allocation56_spill] sm:$0xff] }
 0x1d4   :  { %v1675_v50 = vpop.f32.mrf.mxu1  ;;  %v822_v46 = vadd.f32 %v5282_v42, %v5281_v23  ;;  %v830_v35 = vadd.f32 %v5288_v58, %v5287_v62 }
 0x1d5   :  { %v1978_v53 = vpack.c.bf16 %v1928_v21, %v1926_v38  ;;  %v1929_v31 = vmax.f32 %v1865_v37, 0.0  ;;  %v1791_v39 = vadd.f32 %v1675_v50, %v1348_v54  ;;  %v1866_v20 = vadd.f32 %v4635_v57, %v1790_v47  ;;  %v5284_v38 = vld [vmem:[#allocation52_spill] sm:$0xff]  ;;  %v4787_v37 = vpop.f32.mrf.mxu0 }
 0x1d6   :  { %v1677_v18 = vpop.f32.mrf.mxu1  ;;  %v826_v21 = vadd.f32 %v5284_v38, %v5283_v44  ;;  %v828_v50 = vadd.f32 %v5286_v5, %v5285_v12  ;;  %v1358_v44 = vadd.f32 %v4697_v43, %v832_v1 }
 0x1d7   :  { %v1792_v56 = vadd.f32 %v1677_v18, %v1349_v26  ;;  %v1979_v22 = vpack.c.bf16 %v1929_v31, %v1927_v36  ;;  %v1867_v8 = vadd.f32 %v4646_v49, %v1791_v39  ;;  %v1930_v55 = vmax.f32 %v1866_v20, 0.0  ;;  %v4795_v18 = vpop.f32.mrf.mxu0 }
 0x1d8   :  { %v1679_v52 = vpop.f32.mrf.mxu1 }
 0x1d9   :  { %v1868_v51 = vadd.f32 %v4635_v57, %v1792_v56  ;;  %v1793_v30 = vadd.f32 %v1679_v52, %v1350_v60  ;;  %2294 = vmatprep.mubr.bf16.mxu0 %v1979_v22  ;;  %v1931_v25 = vmax.f32 %v1867_v8, 0.0  ;;  %v1355_v60 = vadd.f32 %v4667_v6, %v826_v21  ;;  %v4807_v23 = vpop.f32.mrf.mxu0 }
 0x1da   :  { %v1683_v40 = vpop.f32.mrf.mxu1  ;;  %2295 = vmatmul.mubr.bf16.gmra.mxu0 %v1978_v53  ;;  %v1354_v53 = vadd.f32 %v4663_v13, %v822_v46  ;;  %v1356_v13 = vadd.f32 %v4680_v61, %v828_v50  ;;  %v1357_v6 = vadd.f32 %v4684_v41, %v830_v35 }
 0x1db   :  { %v1932_v54 = vmax.f32 %v1868_v51, 0.0  ;;  %v1869_v9 = vadd.f32 %v4646_v49, %v1793_v30  ;;  %v1794_v27 = vadd.f32 %v1683_v40, %v1351_v34  ;;  %v5291_v30 = vld [vmem:[#allocation13_spill] sm:$0xff] }
 0x1dc   :  { %v1685_v47 = vpop.f32.mrf.mxu1 }
 0x1dd   :  { %v1980_v10 = vpack.c.bf16 %v1932_v54, %v1930_v55  ;;  %v1933_v26 = vmax.f32 %v1869_v9, 0.0  ;;  %v1795_v15 = vadd.f32 %v1685_v47, %v1352_v19  ;;  %v1870_v31 = vadd.f32 %v4635_v57, %v1794_v27  ;;  %v5293_v54 = vld [vmem:[#allocation14_spill] sm:$0xff]  ;;  %v5294_v9 = vld [vmem:[#allocation57_spill] sm:$0xff]  ;;  %v5295_v47 = vld [vmem:[#allocation15_spill] sm:$0xff] }
 0x1de   :  { %v1687_v36 = vpop.f32.mrf.mxu1  ;;  %v836_v19 = vadd.f32 %v5292_v4, %v5291_v30  ;;  %v838_v27 = vadd.f32 %v5294_v9, %v5293_v54  ;;  %v5303_v4 = vld [vmem:[#allocation19_spill] sm:$0xff] }
 0x1df   :  { %v1796_v39 = vadd.f32 %v1687_v36, %v1353_v28  ;;  %v1981_v45 = vpack.c.bf16 %v1933_v26, %v1931_v25  ;;  %v1871_v20 = vadd.f32 %v4646_v49, %v1795_v15  ;;  %v1934_v32 = vmax.f32 %v1870_v31, 0.0  ;;  %v5296_v25 = vld [vmem:[#allocation58_spill] sm:$0xff]  ;;  %v4815_v26 = vpop.f32.mrf.mxu0  ;;  %v5298_v31 = vld [vmem:[#allocation60_spill] sm:$0xff] }
 0x1e0   :  { %v1689_v24 = vpop.f32.mrf.mxu1  ;;  %v1359_v12 = vadd.f32 %v4701_v29, %v836_v19  ;;  %v1360_v43 = vadd.f32 %v4714_v16, %v838_v27  ;;  %v5304_v19 = vld [vmem:[#allocation64_spill] sm:$0xff] }
 0x1e1   :  { %v1872_v56 = vadd.f32 %v4635_v57, %v1796_v39  ;;  %v1797_v22 = vadd.f32 %v1689_v24, %v1354_v53  ;;  %2304 = vmatprep.mubr.bf16.mxu0 %v1981_v45  ;;  %v1935_v46 = vmax.f32 %v1871_v20, 0.0  ;;  %v5297_v53 = vld [vmem:[#allocation16_spill] sm:$0xff]  ;;  %v5300_v20 = vld [vmem:[#allocation61_spill] sm:$0xff] }
 0x1e2   :  { %v1693_v52 = vpop.f32.mrf.mxu1  ;;  %2305 = vmatmul.mubr.bf16.gmra.mxu0 %v1980_v10  ;;  %v840_v10 = vadd.f32 %v5296_v25, %v5295_v47  ;;  %v842_v39 = vadd.f32 %v5298_v31, %v5297_v53  ;;  %v5305_v27 = vld [vmem:[#allocation20_spill] sm:$0xff]  ;;  %v5309_v31 = vld [vmem:[#allocation22_spill] sm:$0xff] }
 0x1e3   :  { %v1936_v34 = vmax.f32 %v1872_v56, 0.0  ;;  %v1873_v8 = vadd.f32 %v4646_v49, %v1797_v22  ;;  %v1798_v51 = vadd.f32 %v1693_v52, %v1355_v60  ;;  %v5299_v60 = vld [vmem:[#allocation17_spill] sm:$0xff]  ;;  %v4827_v22 = vpop.f32.mrf.mxu0  ;;  %v5301_v52 = vld [vmem:[#allocation18_spill] sm:$0xff] }
 0x1e4   :  { %v1695_v42 = vpop.f32.mrf.mxu1  ;;  %v1361_v29 = vadd.f32 %v4718_v3, %v840_v10  ;;  %v846_v56 = vadd.f32 %v5300_v20, %v5299_v60  ;;  %v5307_v10 = vld [vmem:[#allocation21_spill] sm:$0xff]  ;;  %v5312_v60 = vld [vmem:[#allocation70_spill] sm:$0xff] }
 0x1e5   :  { %v1982_v61 = vpack.c.bf16 %v1936_v34, %v1934_v32  ;;  %v1937_v40 = vmax.f32 %v1873_v8, 0.0  ;;  %v1799_v55 = vadd.f32 %v1695_v42, %v1356_v13  ;;  %v1874_v38 = vadd.f32 %v4635_v57, %v1798_v51  ;;  %v5302_v32 = vld [vmem:[#allocation63_spill] sm:$0xff] }
 0x1e6   :  { %v1697_v28 = vpop.f32.mrf.mxu1  ;;  %v848_v34 = vadd.f32 %v5302_v32, %v5301_v52  ;;  %v1362_v51 = vadd.f32 %v4731_v33, %v842_v39  ;;  %v850_v42 = vadd.f32 %v5304_v19, %v5303_v4  ;;  %v5310_v39 = vld [vmem:[#allocation69_spill] sm:$0xff]  ;;  %v5314_v32 = vld [vmem:[#allocation72_spill] sm:$0xff] }
 0x1e7   :  { %v1800_v21 = vadd.f32 %v1697_v28, %v1357_v6  ;;  %v1983_v41 = vpack.c.bf16 %v1937_v40, %v1935_v46  ;;  %v1875_v5 = vadd.f32 %v4646_v49, %v1799_v55  ;;  %v1938_v62 = vmax.f32 %v1874_v38, 0.0  ;;  %v4835_v46 = vpop.f32.mrf.mxu0  ;;  %v5306_v28 = vld [vmem:[#allocation66_spill] sm:$0xff]  ;;  %v5315_v4 = vld [vmem:[#allocation25_spill] sm:$0xff] }
 0x1e8   :  { %v1699_v15 = vpop.f32.mrf.mxu1  ;;  %v1363_v40 = vadd.f32 %v4735_v59, %v846_v56  ;;  %v1364_v33 = vadd.f32 %v4748_v7, %v848_v34  ;;  %v1365_v59 = vadd.f32 %v4752_v2, %v850_v42  ;;  %v5316_v19 = vld [vmem:[#allocation73_spill] sm:$0xff] }
 0x1e9   :  { %v1876_v50 = vadd.f32 %v4635_v57, %v1800_v21  ;;  %v1801_v36 = vadd.f32 %v1699_v15, %v1358_v44  ;;  %2314 = vmatprep.mubr.bf16.mxu0 %v1983_v41  ;;  %v1939_v48 = vmax.f32 %v1875_v5, 0.0  ;;  %v852_v44 = vadd.f32 %v5306_v28, %v5305_v27  ;;  %v5308_v15 = vld [vmem:[#allocation67_spill] sm:$0xff]  ;;  %v4847_v5 = vpop.f32.mrf.mxu0 }
 0x1ea   :  { %v1703_v45 = vpop.f32.mrf.mxu1  ;;  %2315 = vmatmul.mubr.bf16.gmra.mxu0 %v1982_v61  ;;  %v866_v42 = vadd.f32 %v5316_v19, %v5315_v4  ;;  %v5318_v27 = vld [vmem:[#allocation75_spill] sm:$0xff] }
 0x1eb   :  { %v1940_v58 = vmax.f32 %v1876_v50, 0.0  ;;  %v1877_v35 = vadd.f32 %v4646_v49, %v1801_v36  ;;  %v1802_v24 = vadd.f32 %v1703_v45, %v1359_v12  ;;  %v856_v12 = vadd.f32 %v5308_v15, %v5307_v10  ;;  %v1300_v56 = vpop.f32.mrf.mxu0 }
 0x1ec   :  { %v1705_v13 = vpop.f32.mrf.mxu1  ;;  %v858_v45 = vadd.f32 %v5310_v39, %v5309_v31 }
 0x1ed   :  { %v1984_v16 = vpack.c.bf16 %v1940_v58, %v1938_v62  ;;  %v1941_v0 = vmax.f32 %v1877_v35, 0.0  ;;  %v1803_v1 = vadd.f32 %v1705_v13, %v1360_v43  ;;  %v1878_v6 = vadd.f32 %v4635_v57, %v1802_v24 }
 0x1ee   :  { %v1707_v8 = vpop.f32.mrf.mxu1  ;;  %v1366_v58 = vadd.f32 %v4767_v14, %v852_v44  ;;  %v1368_v52 = vadd.f32 %v4787_v37, %v858_v45  ;;  %v5313_v14 = vld [vmem:[#allocation24_spill] sm:$0xff] }
 0x1ef   :  { %v1804_v30 = vadd.f32 %v1707_v8, %v1361_v29  ;;  %v1985_v3 = vpack.c.bf16 %v1941_v0, %v1939_v48  ;;  %v1879_v55 = vadd.f32 %v4646_v49, %v1803_v1  ;;  %v1942_v21 = vmax.f32 %v1878_v6, 0.0  ;;  %v5311_v29 = vld [vmem:[#allocation23_spill] sm:$0xff] }
 0x1f0   :  { %v1709_v61 = vpop.f32.mrf.mxu1  ;;  %v860_v20 = vadd.f32 %v5312_v60, %v5311_v29  ;;  %v1367_v48 = vadd.f32 %v4775_v11, %v856_v12  ;;  %v862_v34 = vadd.f32 %v5314_v32, %v5313_v14  ;;  %v1371_v12 = vadd.f32 %v4815_v26, %v866_v42 }
 0x1f1   :  { %v1880_v54 = vadd.f32 %v4635_v57, %v1804_v30  ;;  %v1805_v9 = vadd.f32 %v1709_v61, %v1362_v51  ;;  %2324 = vmatprep.mubr.bf16.mxu0 %v1985_v3  ;;  %v1943_v36 = vmax.f32 %v1879_v55, 0.0  ;;  %v1302_v61 = vpop.f32.mrf.mxu0 }
 0x1f2   :  { %v1713_v38 = vpop.f32.mrf.mxu1  ;;  %2325 = vmatmul.mubr.bf16.gmra.mxu0 %v1984_v16  ;;  %v1369_v11 = vadd.f32 %v4795_v18, %v860_v20  ;;  %v5319_v18 = vld [vmem:[#allocation27_spill] sm:$0xff] }
 0x1f3   :  { %v1944_v41 = vmax.f32 %v1880_v54, 0.0  ;;  %v1881_v47 = vadd.f32 %v4646_v49, %v1805_v9  ;;  %v1806_v25 = vadd.f32 %v1713_v38, %v1363_v40  ;;  %v1370_v38 = vadd.f32 %v4807_v23, %v862_v34  ;;  %v1304_v10 = vpop.f32.mrf.mxu0  ;;  %v5321_v23 = vld [vmem:[#allocation28_spill] sm:$0xff] }
 0x1f4   :  { %v1715_v50 = vpop.f32.mrf.mxu1 }
 0x1f5   :  { %v1986_v7 = vpack.c.bf16 %v1944_v41, %v1942_v21  ;;  %v1945_v43 = vmax.f32 %v1881_v47, 0.0  ;;  %v1807_v53 = vadd.f32 %v1715_v50, %v1364_v33  ;;  %v1882_v35 = vadd.f32 %v4635_v57, %v1806_v25  ;;  %v5317_v33 = vld [vmem:[#allocation26_spill] sm:$0xff]  ;;  %v5320_v25 = vld [vmem:[#allocation76_spill] sm:$0xff]  ;;  %v1306_v60 = vpop.f32.mrf.mxu0 }
 0x1f6   :  { %v1717_v62 = vpop.f32.mrf.mxu1  ;;  %v868_v28 = vadd.f32 %v5318_v27, %v5317_v33 }
 0x1f7   :  { %v1808_v24 = vadd.f32 %v1717_v62, %v1365_v59  ;;  %v1987_v2 = vpack.c.bf16 %v1945_v43, %v1943_v36  ;;  %v1883_v16 = vadd.f32 %v4646_v49, %v1807_v53  ;;  %v1946_v51 = vmax.f32 %v1882_v35, 0.0  ;;  %v5322_v53 = vld [vmem:[#allocation78_spill] sm:$0xff] }
 0x1f8   :  { %v1719_v13 = vpop.f32.mrf.mxu1  ;;  %v870_v59 = vadd.f32 %v5320_v25, %v5319_v18  ;;  %v1372_v43 = vadd.f32 %v4827_v22, %v868_v28  ;;  %v872_v31 = vadd.f32 %v5322_v53, %v5321_v23 }
 0x1f9   :  { %v1884_v0 = vadd.f32 %v4635_v57, %v1808_v24  ;;  %v1809_v1 = vadd.f32 %v1719_v13, %v1366_v58  ;;  %2334 = vmatprep.mubr.bf16.mxu0 %v1987_v2  ;;  %v1947_v55 = vmax.f32 %v1883_v16, 0.0  ;;  %v5323_v24 = vld [vmem:[#allocation29_spill] sm:$0xff]  ;;  %v5324_v2 = vld [vmem:[#allocation79_spill] sm:$0xff] }
 0x1fa   :  { %v1723_v8 = vpop.f32.mrf.mxu1  ;;  %2335 = vmatmul.mubr.bf16.gmra.mxu0 %v1986_v7  ;;  %v1373_v26 = vadd.f32 %v4835_v46, %v870_v59  ;;  %v876_v29 = vadd.f32 %v5324_v2, %v5323_v24  ;;  %v1374_v32 = vadd.f32 %v4847_v5, %v872_v31  ;;  %v5327_v46 = vld [vmem:[#allocation31_spill] sm:$0xff] }
 0x1fb   :  { %v1948_v6 = vmax.f32 %v1884_v0, 0.0  ;;  %v1885_v30 = vadd.f32 %v4646_v49, %v1809_v1  ;;  %v1810_v3 = vadd.f32 %v1723_v8, %v1367_v48  ;;  %v5325_v0 = vld [vmem:[#allocation30_spill] sm:$0xff]  ;;  %v5326_v1 = vld [vmem:[#allocation81_spill] sm:$0xff] }
 0x1fc   :  { %v1725_v40 = vpop.f32.mrf.mxu1  ;;  %v1375_v4 = vadd.f32 %v1300_v56, %v876_v29  ;;  %v5332_v56 = vld [vmem:[#allocation85_spill] sm:$0xff] }
 0x1fd   :  { %v1988_v54 = vpack.c.bf16 %v1948_v6, %v1946_v51  ;;  %v1949_v37 = vmax.f32 %v1885_v30, 0.0  ;;  %v1811_v9 = vadd.f32 %v1725_v40, %v1368_v52  ;;  %v1886_v21 = vadd.f32 %v4635_v57, %v1810_v3  ;;  %v5328_v6 = vld [vmem:[#allocation82_spill] sm:$0xff]  ;;  %v1310_v3 = vpop.f32.mrf.mxu0 }
 0x1fe   :  { %v1727_v44 = vpop.f32.mrf.mxu1  ;;  %v878_v52 = vadd.f32 %v5326_v1, %v5325_v0  ;;  %v880_v30 = vadd.f32 %v5328_v6, %v5327_v46 }
 0x1ff   :  { %v1812_v41 = vadd.f32 %v1727_v44, %v1369_v11  ;;  %v1989_v47 = vpack.c.bf16 %v1949_v37, %v1947_v55  ;;  %v1887_v50 = vadd.f32 %v4646_v49, %v1811_v9  ;;  %v1950_v45 = vmax.f32 %v1886_v21, 0.0  ;;  %v5330_v37 = vld [vmem:[#allocation84_spill] sm:$0xff]  ;;  %v5331_v21 = vld [vmem:[#allocation34_spill] sm:$0xff] }
 0x200   :  { %v1729_v15 = vpop.f32.mrf.mxu1  ;;  %v1376_v55 = vadd.f32 %v1302_v61, %v878_v52 }
 0x201   :  { %v1888_v36 = vadd.f32 %v4635_v57, %v1812_v41  ;;  %v1813_v7 = vadd.f32 %v1729_v15, %v1370_v38  ;;  %2344 = vmatprep.mubr.bf16.mxu0 %v1989_v47  ;;  %v1951_v13 = vmax.f32 %v1887_v50, 0.0  ;;  %v1377_v38 = vadd.f32 %v1304_v10, %v880_v30  ;;  %v1312_v47 = vpop.f32.mrf.mxu0  ;;  %v5334_v50 = vld [vmem:[#allocation87_spill] sm:$0xff]  ;;  %v5336_v10 = vld [vmem:[#allocation88_spill] sm:$0xff] }
 0x202   :  { %v1733_v39 = vpop.f32.mrf.mxu1  ;;  %2345 = vmatmul.mubr.bf16.gmra.mxu0 %v1988_v54  ;;  %v5329_v54 = vld [vmem:[#allocation32_spill] sm:$0xff]  ;;  %v886_v41 = vadd.f32 %v5332_v56, %v5331_v21 }
 0x203   :  { %v1952_v62 = vmax.f32 %v1888_v36, 0.0  ;;  %v1889_v58 = vadd.f32 %v4646_v49, %v1813_v7  ;;  %v1814_v35 = vadd.f32 %v1733_v39, %v1371_v12  ;;  %v882_v5 = vadd.f32 %v5330_v37, %v5329_v54  ;;  %v5333_v12 = vld [vmem:[#allocation35_spill] sm:$0xff]  ;;  %v5335_v39 = vld [vmem:[#allocation36_spill] sm:$0xff] }
 0x204   :  { %v1735_v20 = vpop.f32.mrf.mxu1  ;;  %v888_v36 = vadd.f32 %v5334_v50, %v5333_v12 }
 0x205   :  { %v1990_v48 = vpack.c.bf16 %v1952_v62, %v1950_v45  ;;  %v1953_v22 = vmax.f32 %v1889_v58, 0.0  ;;  %v1815_v16 = vadd.f32 %v1735_v20, %v1372_v43  ;;  %v1890_v34 = vadd.f32 %v4635_v57, %v1814_v35  ;;  %v1314_v62 = vpop.f32.mrf.mxu0  ;;  %v5337_v20 = vld [vmem:[#allocation37_spill] sm:$0xff] }
 0x206   :  { %v1737_v14 = vpop.f32.mrf.mxu1  ;;  %v1378_v43 = vadd.f32 %v1306_v60, %v882_v5  ;;  %v890_v45 = vadd.f32 %v5336_v10, %v5335_v39  ;;  %v1379_v35 = vadd.f32 %v1310_v3, %v886_v41  ;;  %v1380_v29 = vadd.f32 %v1312_v47, %v888_v36 }
 0x207   :  { %v1816_v8 = vadd.f32 %v1737_v14, %v1373_v26  ;;  %v1991_v51 = vpack.c.bf16 %v1953_v22, %v1951_v13  ;;  %v1891_v19 = vadd.f32 %v4646_v49, %v1815_v16  ;;  %v1954_v33 = vmax.f32 %v1890_v34, 0.0  ;;  %v5338_v13 = vld [vmem:[#allocation90_spill] sm:$0xff]  ;;  %v1316_v14 = vpop.f32.mrf.mxu0 }
 0x208   :  { %v1739_v11 = vpop.f32.mrf.mxu1  ;;  %v892_v60 = vadd.f32 %v5338_v13, %v5337_v20  ;;  %v1381_v52 = vadd.f32 %v1314_v62, %v890_v45 }
 0x209   :  { %v1892_v42 = vadd.f32 %v4635_v57, %v1816_v8  ;;  %v1817_v40 = vadd.f32 %v1739_v11, %v1374_v32  ;;  %2354 = vmatprep.mubr.bf16.mxu0 %v1991_v51  ;;  %v1955_v25 = vmax.f32 %v1891_v19, 0.0 }
 0x20a   :  { %v1743_v9 = vpop.f32.mrf.mxu1  ;;  %2355 = vmatmul.mubr.bf16.gmra.mxu0 %v1990_v48  ;;  %v1382_v30 = vadd.f32 %v1316_v14, %v892_v60 }
 0x20b   :  { %v1956_v27 = vmax.f32 %v1892_v42, 0.0  ;;  %v1893_v28 = vadd.f32 %v4646_v49, %v1817_v40  ;;  %v1818_v44 = vadd.f32 %v1743_v9, %v1375_v4 }
 0x20c   :  { %v1745_v18 = vpop.f32.mrf.mxu1 }
 0x20d   :  { %v1992_v59 = vpack.c.bf16 %v1956_v27, %v1954_v33  ;;  %v1957_v15 = vmax.f32 %v1893_v28, 0.0  ;;  %v1819_v61 = vadd.f32 %v1745_v18, %v1376_v55  ;;  %v1894_v23 = vadd.f32 %v4635_v57, %v1818_v44  ;;  %v2030_v44 = vld [vmem:[%s5157_s10] sm:$0x3] }
 0x20e   :  { %v1747_v7 = vpop.f32.mrf.mxu1  ;;  %v4917_v21 = vrot.slane %v2030_v44, %v1834_v17 }
 0x20f   :  { %v1820_v53 = vadd.f32 %v1747_v7, %v1377_v38  ;;  %v1993_v31 = vpack.c.bf16 %v1957_v15, %v1955_v25  ;;  %v1895_v26 = vadd.f32 %v4646_v49, %v1819_v61  ;;  %v1958_v22 = vmax.f32 %v1894_v23, 0.0 }
 0x210   :  { %v1749_v58 = vpop.f32.mrf.mxu1  ;;  %v5339_v38 = vsub.s32 0, %v4604_v63 }
 0x211   :  { %v1896_v24 = vadd.f32 %v4635_v57, %v1820_v53  ;;  %v1821_v2 = vadd.f32 %v1749_v58, %v1378_v43  ;;  %2364 = vmatprep.mubr.bf16.mxu0 %v1993_v31  ;;  %v1959_v34 = vmax.f32 %v1895_v26, 0.0 }
 0x212   :  { %v1753_v48 = vpop.f32.mrf.mxu1  ;;  %2365 = vmatmul.mubr.bf16.gmra.mxu0 %v1992_v59 }
 0x213   :  { %v1960_v16 = vmax.f32 %v1896_v24, 0.0  ;;  %v1897_v0 = vadd.f32 %v4646_v49, %v1821_v2  ;;  %v1822_v1 = vadd.f32 %v1753_v48, %v1379_v35 }
 0x214   :  { %v1755_v32 = vpop.f32.mrf.mxu1 }
 0x215   :  { %v1994_v8 = vpack.c.bf16 %v1960_v16, %v1958_v22  ;;  %v1961_v51 = vmax.f32 %v1897_v0, 0.0  ;;  %v1823_v46 = vadd.f32 %v1755_v32, %v1380_v29  ;;  %v1898_v3 = vadd.f32 %v4635_v57, %v1822_v1 }
 0x216   :  { %v1757_v6 = vpop.f32.mrf.mxu1 }
 0x217   :  { %v1824_v11 = vadd.f32 %v1757_v6, %v1381_v52  ;;  %v1995_v4 = vpack.c.bf16 %v1961_v51, %v1959_v34  ;;  %v1899_v42 = vadd.f32 %v4646_v49, %v1823_v46  ;;  %v1962_v54 = vmax.f32 %v1898_v3, 0.0 }
 0x218   :  { %v1759_v19 = vpop.f32.mrf.mxu1 }
 0x219   :  { %v1900_v40 = vadd.f32 %v4635_v57, %v1824_v11  ;;  %v1825_v55 = vadd.f32 %v1759_v19, %v1382_v30  ;;  %2374 = vmatprep.mubr.bf16.mxu0 %v1995_v4  ;;  %v1963_v9 = vmax.f32 %v1899_v42, 0.0  ;;  %v4913_v57 = vrot.slane %v2030_v44, %v5339_v38 }
 0x21a   :  { %2375 = vmatmul.mubr.bf16.gmra.mxu0 %v1994_v8 }
 0x21b   :  { %v1964_v37 = vmax.f32 %v1900_v40, 0.0  ;;  %v1901_v5 = vadd.f32 %v4646_v49, %v1825_v55 }
 0x21d   :  { %v1996_v33 = vpack.c.bf16 %v1964_v37, %v1962_v54  ;;  %v1965_v27 = vmax.f32 %v1901_v5, 0.0  ;;  %v4937_v5 = vpop.permute.xlu1 %2626 }
 0x21f   :  { %v1997_v28 = vpack.c.bf16 %v1965_v27, %v1963_v9 }
 0x221   :  { %2384 = vmatprep.mubr.bf16.mxu0 %v1997_v28 }
 0x222   :  { %2385 = vmatmul.mubr.bf16.gmra.mxu0 %v1996_v33 }
 0x26a   :  { %v2236_v56 = vpop.f32.mrf.mxu0 }
 0x26b   :  { %v2237_v49 = vadd.f32 %v2236_v56, %v4913_v57 }
 0x26c   :  { %v2238_v41 = vpop.f32.mrf.mxu0 }
 0x26d   :  { %v2395_v47 = vmax.f32 %v2237_v49, 0.0  ;;  %v2239_v18 = vadd.f32 %v2238_v41, %v4917_v21 }
 0x26e   :  { %v2240_v25 = vpop.f32.mrf.mxu0 }
 0x26f   :  { %v2396_v59 = vmax.f32 %v2239_v18, 0.0  ;;  %v2241_v15 = vadd.f32 %v2240_v25, %v4913_v57  ;;  %2459 = vxpose.xlu0.b32.start [1/16] %v2395_v47, 128  ;;  %v4942_v47 = vpop.permute.xlu1 %2631 }
 0x270   :  { %v2242_v61 = vpop.f32.mrf.mxu0 }
 0x271   :  { %v2397_v12 = vmax.f32 %v2241_v15, 0.0  ;;  %v2243_v50 = vadd.f32 %v2242_v61, %v4917_v21  ;;  %2491 = vxpose.xlu1.b32.start [1/16] %v2396_v59, 128 }
 0x272   :  { %v2246_v36 = vpop.f32.mrf.mxu0 }
 0x273   :  { %v2398_v17 = vmax.f32 %v2243_v50, 0.0  ;;  %v2247_v7 = vadd.f32 %v2246_v36, %v4913_v57  ;;  %2460 = vxpose.xlu0.b32.cont [2/16] %v2397_v12, 128  ;;  %v4946_v50 = vpop.permute.xlu0 %2621 }
 0x274   :  { %v2248_v43 = vpop.f32.mrf.mxu0 }
 0x275   :  { %v2399_v23 = vmax.f32 %v2247_v7, 0.0  ;;  %v2249_v53 = vadd.f32 %v2248_v43, %v4917_v21  ;;  %2492 = vxpose.xlu1.b32.cont [2/16] %v2398_v17, 128  ;;  %v4949_v43 = vpop.permute.xlu1 %2636 }
 0x276   :  { %v2250_v31 = vpop.f32.mrf.mxu0 }
 0x277   :  { %v2400_v39 = vmax.f32 %v2249_v53, 0.0  ;;  %v2251_v10 = vadd.f32 %v2250_v31, %v4913_v57  ;;  %2461 = vxpose.xlu0.b32.cont [3/16] %v2399_v23, 128 }
 0x278   :  { %v2252_v45 = vpop.f32.mrf.mxu0 }
 0x279   :  { %v2401_v62 = vmax.f32 %v2251_v10, 0.0  ;;  %v2253_v58 = vadd.f32 %v2252_v45, %v4917_v21  ;;  %2493 = vxpose.xlu1.b32.cont [3/16] %v2400_v39, 128 }
 0x27a   :  { %v2256_v35 = vpop.f32.mrf.mxu0 }
 0x27b   :  { %v2402_v26 = vmax.f32 %v2253_v58, 0.0  ;;  %v2257_v24 = vadd.f32 %v2256_v35, %v4913_v57  ;;  %2462 = vxpose.xlu0.b32.cont [4/16] %v2401_v62, 128  ;;  %v4953_v62 = vpop.permute.xlu0 %2646 }
 0x27c   :  { %v2258_v2 = vpop.f32.mrf.mxu0 }
 0x27d   :  { %v2403_v29 = vmax.f32 %v2257_v24, 0.0  ;;  %v2259_v20 = vadd.f32 %v2258_v2, %v4917_v21  ;;  %2494 = vxpose.xlu1.b32.cont [4/16] %v2402_v26, 128  ;;  %v4956_v24 = vpop.permute.xlu1 %2641 }
 0x27e   :  { %v2260_v13 = vpop.f32.mrf.mxu0 }
 0x27f   :  { %v2404_v60 = vmax.f32 %v2259_v20, 0.0  ;;  %v2261_v48 = vadd.f32 %v2260_v13, %v4913_v57  ;;  %2463 = vxpose.xlu0.b32.cont [5/16] %v2403_v29, 128 }
 0x280   :  { %v2262_v22 = vpop.f32.mrf.mxu0 }
 0x281   :  { %v2405_v16 = vmax.f32 %v2261_v48, 0.0  ;;  %v2263_v0 = vadd.f32 %v2262_v22, %v4917_v21  ;;  %2495 = vxpose.xlu1.b32.cont [5/16] %v2404_v60, 128  ;;  %v4960_v22 = vpop.permute.xlu0 %2656 }
 0x282   :  { %v2266_v1 = vpop.f32.mrf.mxu0 }
 0x283   :  { %v2406_v52 = vmax.f32 %v2263_v0, 0.0  ;;  %v2267_v14 = vadd.f32 %v2266_v1, %v4913_v57  ;;  %2464 = vxpose.xlu0.b32.cont [6/16] %v2405_v16, 128 }
 0x284   :  { %v2268_v32 = vpop.f32.mrf.mxu0 }
 0x285   :  { %v2407_v34 = vmax.f32 %v2267_v14, 0.0  ;;  %v2269_v8 = vadd.f32 %v2268_v32, %v4917_v21  ;;  %2496 = vxpose.xlu1.b32.cont [6/16] %v2406_v52, 128  ;;  %v4963_v52 = vpop.permute.xlu1 %2651 }
 0x286   :  { %v2270_v51 = vpop.f32.mrf.mxu0 }
 0x287   :  { %v2408_v46 = vmax.f32 %v2269_v8, 0.0  ;;  %v2271_v6 = vadd.f32 %v2270_v51, %v4913_v57  ;;  %2465 = vxpose.xlu0.b32.cont [7/16] %v2407_v34, 128 }
 0x288   :  { %v2272_v30 = vpop.f32.mrf.mxu0 }
 0x289   :  { %v2409_v3 = vmax.f32 %v2271_v6, 0.0  ;;  %v2273_v11 = vadd.f32 %v2272_v30, %v4917_v21  ;;  %2497 = vxpose.xlu1.b32.cont [7/16] %v2408_v46, 128  ;;  %v4967_v6 = vpop.permute.xlu0 %2666 }
 0x28a   :  { %v2276_v4 = vpop.f32.mrf.mxu0 }
 0x28b   :  { %v2410_v19 = vmax.f32 %v2273_v11, 0.0  ;;  %v2277_v42 = vadd.f32 %v2276_v4, %v4913_v57  ;;  %2466 = vxpose.xlu0.b32.cont [8/16] %v2409_v3, 128  ;;  %v4970_v4 = vpop.permute.xlu1 %2661 }
 0x28c   :  { %v2278_v40 = vpop.f32.mrf.mxu0 }
 0x28d   :  { %v2411_v55 = vmax.f32 %v2277_v42, 0.0  ;;  %v2279_v54 = vadd.f32 %v2278_v40, %v4917_v21  ;;  %2498 = vxpose.xlu1.b32.cont [8/16] %v2410_v19, 128 }
 0x28e   :  { %v2280_v37 = vpop.f32.mrf.mxu0 }
 0x28f   :  { %v2412_v9 = vmax.f32 %v2279_v54, 0.0  ;;  %v2281_v33 = vadd.f32 %v2280_v37, %v4913_v57  ;;  %2467 = vxpose.xlu0.b32.cont [9/16] %v2411_v55, 128 }
 0x290   :  { %v2282_v27 = vpop.f32.mrf.mxu0 }
 0x291   :  { %v2413_v28 = vmax.f32 %v2281_v33, 0.0  ;;  %v2283_v44 = vadd.f32 %v2282_v27, %v4917_v21  ;;  %2499 = vxpose.xlu1.b32.cont [9/16] %v2412_v9, 128  ;;  %v4974_v9 = vpop.permute.xlu0 %2676 }
 0x292   :  { %v2286_v38 = vpop.f32.mrf.mxu0 }
 0x293   :  { %v2414_v56 = vmax.f32 %v2283_v44, 0.0  ;;  %v2287_v49 = vadd.f32 %v2286_v38, %v4913_v57  ;;  %2468 = vxpose.xlu0.b32.cont [10/16] %v2413_v28, 128  ;;  %v4977_v44 = vpop.permute.xlu1 %2671 }
 0x294   :  { %v2288_v41 = vpop.f32.mrf.mxu0 }
 0x295   :  { %v2415_v18 = vmax.f32 %v2287_v49, 0.0  ;;  %v2289_v25 = vadd.f32 %v2288_v41, %v4917_v21  ;;  %2500 = vxpose.xlu1.b32.cont [10/16] %v2414_v56, 128 }
 0x296   :  { %v2290_v59 = vpop.f32.mrf.mxu0 }
 0x297   :  { %v2416_v15 = vmax.f32 %v2289_v25, 0.0  ;;  %v2291_v61 = vadd.f32 %v2290_v59, %v4913_v57  ;;  %2469 = vxpose.xlu0.b32.cont [11/16] %v2415_v18, 128  ;;  %v4981_v59 = vpop.permute.xlu0 %2686 }
 0x298   :  { %v2292_v12 = vpop.f32.mrf.mxu0 }
 0x299   :  { %v2417_v36 = vmax.f32 %v2291_v61, 0.0  ;;  %v2293_v17 = vadd.f32 %v2292_v12, %v4917_v21  ;;  %2501 = vxpose.xlu1.b32.cont [11/16] %v2416_v15, 128 }
 0x29a   :  { %v2296_v7 = vpop.f32.mrf.mxu0 }
 0x29b   :  { %v2418_v23 = vmax.f32 %v2293_v17, 0.0  ;;  %v2297_v53 = vadd.f32 %v2296_v7, %v4913_v57  ;;  %2470 = vxpose.xlu0.b32.cont [12/16] %v2417_v36, 128  ;;  %v4984_v36 = vpop.permute.xlu1 %2681 }
 0x29c   :  { %v2298_v31 = vpop.f32.mrf.mxu0 }
 0x29d   :  { %v2419_v39 = vmax.f32 %v2297_v53, 0.0  ;;  %v2299_v10 = vadd.f32 %v2298_v31, %v4917_v21  ;;  %2502 = vxpose.xlu1.b32.cont [12/16] %v2418_v23, 128 }
 0x29e   :  { %v2300_v45 = vpop.f32.mrf.mxu0 }
 0x29f   :  { %v2420_v58 = vmax.f32 %v2299_v10, 0.0  ;;  %v2301_v35 = vadd.f32 %v2300_v45, %v4913_v57  ;;  %2471 = vxpose.xlu0.b32.cont [13/16] %v2419_v39, 128  ;;  %v4988_v10 = vpop.permute.xlu0 %2696 }
 0x2a0   :  { %v2302_v26 = vpop.f32.mrf.mxu0 }
 0x2a1   :  { %v2421_v2 = vmax.f32 %v2301_v35, 0.0  ;;  %v2303_v29 = vadd.f32 %v2302_v26, %v4917_v21  ;;  %2503 = vxpose.xlu1.b32.cont [13/16] %v2420_v58, 128  ;;  %v4991_v26 = vpop.permute.xlu1 %2691 }
 0x2a2   :  { %v2306_v20 = vpop.f32.mrf.mxu0 }
 0x2a3   :  { %v2422_v13 = vmax.f32 %v2303_v29, 0.0  ;;  %v2307_v60 = vadd.f32 %v2306_v20, %v4913_v57  ;;  %2472 = vxpose.xlu0.b32.cont [14/16] %v2421_v2, 128 }
 0x2a4   :  { %v2308_v48 = vpop.f32.mrf.mxu0 }
 0x2a5   :  { %v2423_v16 = vmax.f32 %v2307_v60, 0.0  ;;  %v2309_v0 = vadd.f32 %v2308_v48, %v4917_v21  ;;  %2504 = vxpose.xlu1.b32.cont [14/16] %v2422_v13, 128 }
 0x2a6   :  { %v2310_v1 = vpop.f32.mrf.mxu0 }
 0x2a7   :  { %v2424_v14 = vmax.f32 %v2309_v0, 0.0  ;;  %v2311_v32 = vadd.f32 %v2310_v1, %v4913_v57  ;;  %2473 = vxpose.xlu0.b32.cont [15/16] %v2423_v16, 128  ;;  %v4995_v16 = vpop.permute.xlu0 %2706 }
 0x2a8   :  { %v2312_v34 = vpop.f32.mrf.mxu0 }
 0x2a9   :  { %v2425_v8 = vmax.f32 %v2311_v32, 0.0  ;;  %v2313_v51 = vadd.f32 %v2312_v34, %v4917_v21  ;;  %2505 = vxpose.xlu1.b32.cont [15/16] %v2424_v14, 128  ;;  %v4998_v32 = vpop.permute.xlu1 %2701 }
 0x2aa   :  { %v2316_v46 = vpop.f32.mrf.mxu0 }
 0x2ab   :  { %v2426_v30 = vmax.f32 %v2313_v51, 0.0  ;;  %v2317_v3 = vadd.f32 %v2316_v46, %v4913_v57  ;;  %2474 = vxpose.xlu0.b32.end [16/16] %v2425_v8, 128 }
 0x2ac   :  { %v2318_v11 = vpop.f32.mrf.mxu0 }
 0x2ad   :  { %v2427_v19 = vmax.f32 %v2317_v3, 0.0  ;;  %v2319_v42 = vadd.f32 %v2318_v11, %v4917_v21  ;;  %2506 = vxpose.xlu1.b32.end [16/16] %v2426_v30, 128  ;;  %v5002_v11 = vpop.permute.xlu0 %2716 }
 0x2ae   :  { %v2320_v40 = vpop.f32.mrf.mxu0 }
 0x2af   :  { %v2428_v55 = vmax.f32 %v2319_v42, 0.0  ;;  %v2321_v54 = vadd.f32 %v2320_v40, %v4913_v57  ;;  %2523 = vxpose.xlu0.b32.start [1/16] %v2427_v19, 128 }
 0x2b0   :  { %v2322_v37 = vpop.f32.mrf.mxu0 }
 0x2b1   :  { %v2429_v33 = vmax.f32 %v2321_v54, 0.0  ;;  %v2323_v27 = vadd.f32 %v2322_v37, %v4917_v21  ;;  %2555 = vxpose.xlu1.b32.start [1/16] %v2428_v55, 128  ;;  %v5005_v55 = vpop.permute.xlu1 %2711 }
 0x2b2   :  { %v2326_v28 = vpop.f32.mrf.mxu0 }
 0x2b3   :  { %v2430_v38 = vmax.f32 %v2323_v27, 0.0  ;;  %v2327_v56 = vadd.f32 %v2326_v28, %v4913_v57  ;;  %2524 = vxpose.xlu0.b32.cont [2/16] %v2429_v33, 128 }
 0x2b4   :  { %v2328_v49 = vpop.f32.mrf.mxu0 }
 0x2b5   :  { %v2431_v41 = vmax.f32 %v2327_v56, 0.0  ;;  %v2329_v18 = vadd.f32 %v2328_v49, %v4917_v21  ;;  %2556 = vxpose.xlu1.b32.cont [2/16] %v2430_v38, 128  ;;  %v5009_v56 = vpop.permute.xlu0 %2726 }
 0x2b6   :  { %v2330_v25 = vpop.f32.mrf.mxu0 }
 0x2b7   :  { %v2432_v15 = vmax.f32 %v2329_v18, 0.0  ;;  %v2331_v61 = vadd.f32 %v2330_v25, %v4913_v57  ;;  %2525 = vxpose.xlu0.b32.cont [3/16] %v2431_v41, 128  ;;  %v5012_v25 = vpop.permute.xlu1 %2721 }
 0x2b8   :  { %v2332_v12 = vpop.f32.mrf.mxu0 }
 0x2b9   :  { %v2433_v17 = vmax.f32 %v2331_v61, 0.0  ;;  %v2333_v7 = vadd.f32 %v2332_v12, %v4917_v21  ;;  %2557 = vxpose.xlu1.b32.cont [3/16] %v2432_v15, 128 }
 0x2ba   :  { %v2336_v23 = vpop.f32.mrf.mxu0 }
 0x2bb   :  { %v2434_v53 = vmax.f32 %v2333_v7, 0.0  ;;  %v2337_v31 = vadd.f32 %v2336_v23, %v4913_v57  ;;  %2526 = vxpose.xlu0.b32.cont [4/16] %v2433_v17, 128 }
 0x2bc   :  { %v2338_v39 = vpop.f32.mrf.mxu0 }
 0x2bd   :  { %v2435_v45 = vmax.f32 %v2337_v31, 0.0  ;;  %v2339_v58 = vadd.f32 %v2338_v39, %v4917_v21  ;;  %2558 = vxpose.xlu1.b32.cont [4/16] %v2434_v53, 128  ;;  %v5016_v53 = vpop.permute.xlu0 %2736 }
 0x2be   :  { %v2340_v35 = vpop.f32.mrf.mxu0 }
 0x2bf   :  { %v2436_v2 = vmax.f32 %v2339_v58, 0.0  ;;  %v2341_v29 = vadd.f32 %v2340_v35, %v4913_v57  ;;  %2527 = vxpose.xlu0.b32.cont [5/16] %v2435_v45, 128  ;;  %v5019_v58 = vpop.permute.xlu1 %2731 }
 0x2c0   :  { %v2342_v20 = vpop.f32.mrf.mxu0 }
 0x2c1   :  { %v2437_v13 = vmax.f32 %v2341_v29, 0.0  ;;  %v2343_v60 = vadd.f32 %v2342_v20, %v4917_v21  ;;  %2559 = vxpose.xlu1.b32.cont [5/16] %v2436_v2, 128 }
 0x2c2   :  { %v2346_v48 = vpop.f32.mrf.mxu0 }
 0x2c3   :  { %v2438_v0 = vmax.f32 %v2343_v60, 0.0  ;;  %v2347_v1 = vadd.f32 %v2346_v48, %v4913_v57  ;;  %2528 = vxpose.xlu0.b32.cont [6/16] %v2437_v13, 128  ;;  %v5023_v48 = vpop.permute.xlu0 %2746 }
 0x2c4   :  { %v2348_v14 = vpop.f32.mrf.mxu0 }
 0x2c5   :  { %v2439_v34 = vmax.f32 %v2347_v1, 0.0  ;;  %v2349_v8 = vadd.f32 %v2348_v14, %v4917_v21  ;;  %2560 = vxpose.xlu1.b32.cont [6/16] %v2438_v0, 128 }
 0x2c6   :  { %v2350_v51 = vpop.f32.mrf.mxu0 }
 0x2c7   :  { %v2440_v46 = vmax.f32 %v2349_v8, 0.0  ;;  %v2351_v30 = vadd.f32 %v2350_v51, %v4913_v57  ;;  %2529 = vxpose.xlu0.b32.cont [7/16] %v2439_v34, 128  ;;  %v5026_v34 = vpop.permute.xlu1 %2741 }
 0x2c8   :  { %v2352_v3 = vpop.f32.mrf.mxu0 }
 0x2c9   :  { %v2441_v19 = vmax.f32 %v2351_v30, 0.0  ;;  %v2353_v42 = vadd.f32 %v2352_v3, %v4917_v21  ;;  %2561 = vxpose.xlu1.b32.cont [7/16] %v2440_v46, 128 }
 0x2ca   :  { %v2356_v40 = vpop.f32.mrf.mxu0 }
 0x2cb   :  { %v2442_v54 = vmax.f32 %v2353_v42, 0.0  ;;  %v2357_v37 = vadd.f32 %v2356_v40, %v4913_v57  ;;  %2530 = vxpose.xlu0.b32.cont [8/16] %v2441_v19, 128  ;;  %v5030_v42 = vpop.permute.xlu0 %2756 }
 0x2cc   :  { %v2358_v33 = vpop.f32.mrf.mxu0 }
 0x2cd   :  { %v2443_v27 = vmax.f32 %v2357_v37, 0.0  ;;  %v2359_v28 = vadd.f32 %v2358_v33, %v4917_v21  ;;  %2562 = vxpose.xlu1.b32.cont [8/16] %v2442_v54, 128  ;;  %v5033_v33 = vpop.permute.xlu1 %2751 }
 0x2ce   :  { %v2360_v38 = vpop.f32.mrf.mxu0 }
 0x2cf   :  { %v2444_v49 = vmax.f32 %v2359_v28, 0.0  ;;  %v2361_v41 = vadd.f32 %v2360_v38, %v4913_v57  ;;  %2531 = vxpose.xlu0.b32.cont [9/16] %v2443_v27, 128 }
 0x2d0   :  { %v2362_v18 = vpop.f32.mrf.mxu0 }
 0x2d1   :  { %v2445_v15 = vmax.f32 %v2361_v41, 0.0  ;;  %v2363_v61 = vadd.f32 %v2362_v18, %v4917_v21  ;;  %2563 = vxpose.xlu1.b32.cont [9/16] %v2444_v49, 128 }
 0x2d2   :  { %v2366_v12 = vpop.f32.mrf.mxu0 }
 0x2d3   :  { %v2446_v17 = vmax.f32 %v2363_v61, 0.0  ;;  %v2367_v7 = vadd.f32 %v2366_v12, %v4913_v57  ;;  %2532 = vxpose.xlu0.b32.cont [10/16] %v2445_v15, 128  ;;  %v5037_v15 = vpop.permute.xlu0 %2766 }
 0x2d4   :  { %v2368_v23 = vpop.f32.mrf.mxu0 }
 0x2d5   :  { %v2447_v31 = vmax.f32 %v2367_v7, 0.0  ;;  %v2369_v39 = vadd.f32 %v2368_v23, %v4917_v21  ;;  %2564 = vxpose.xlu1.b32.cont [10/16] %v2446_v17, 128  ;;  %v5040_v7 = vpop.permute.xlu1 %2761 }
 0x2d6   :  { %v2370_v45 = vpop.f32.mrf.mxu0 }
 0x2d7   :  { %v2448_v35 = vmax.f32 %v2369_v39, 0.0  ;;  %v2371_v2 = vadd.f32 %v2370_v45, %v4913_v57  ;;  %2533 = vxpose.xlu0.b32.cont [11/16] %v2447_v31, 128 }
 0x2d8   :  { %v2372_v29 = vpop.f32.mrf.mxu0 }
 0x2d9   :  { %v2449_v20 = vmax.f32 %v2371_v2, 0.0  ;;  %v2373_v13 = vadd.f32 %v2372_v29, %v4917_v21  ;;  %2565 = vxpose.xlu1.b32.cont [11/16] %v2448_v35, 128 }
 0x2da   :  { %v2376_v60 = vpop.f32.mrf.mxu0 }
 0x2db   :  { %v2450_v0 = vmax.f32 %v2373_v13, 0.0  ;;  %v2377_v1 = vadd.f32 %v2376_v60, %v4913_v57  ;;  %2534 = vxpose.xlu0.b32.cont [12/16] %v2449_v20, 128 }
 0x2dc   :  { %v2378_v14 = vpop.f32.mrf.mxu0 }
 0x2dd   :  { %v2451_v8 = vmax.f32 %v2377_v1, 0.0  ;;  %v2379_v51 = vadd.f32 %v2378_v14, %v4917_v21  ;;  %2566 = vxpose.xlu1.b32.cont [12/16] %v2450_v0, 128 }
 0x2de   :  { %v2380_v46 = vpop.f32.mrf.mxu0 }
 0x2df   :  { %v2452_v30 = vmax.f32 %v2379_v51, 0.0  ;;  %v2381_v3 = vadd.f32 %v2380_v46, %v4913_v57  ;;  %2535 = vxpose.xlu0.b32.cont [13/16] %v2451_v8, 128 }
 0x2e0   :  { %v2382_v19 = vpop.f32.mrf.mxu0 }
 0x2e1   :  { %v2453_v40 = vmax.f32 %v2381_v3, 0.0  ;;  %v2383_v54 = vadd.f32 %v2382_v19, %v4917_v21  ;;  %2567 = vxpose.xlu1.b32.cont [13/16] %v2452_v30, 128 }
 0x2e2   :  { %v2386_v37 = vpop.f32.mrf.mxu0 }
 0x2e3   :  { %v2454_v27 = vmax.f32 %v2383_v54, 0.0  ;;  %v2387_v28 = vadd.f32 %v2386_v37, %v4913_v57  ;;  %2536 = vxpose.xlu0.b32.cont [14/16] %v2453_v40, 128 }
 0x2e4   :  { %v2388_v38 = vpop.f32.mrf.mxu0 }
 0x2e5   :  { %v2455_v49 = vmax.f32 %v2387_v28, 0.0  ;;  %v2389_v41 = vadd.f32 %v2388_v38, %v4917_v21  ;;  %2568 = vxpose.xlu1.b32.cont [14/16] %v2454_v27, 128 }
 0x2e6   :  { %v2390_v18 = vpop.f32.mrf.mxu0 }
 0x2e7   :  { %v2456_v61 = vmax.f32 %v2389_v41, 0.0  ;;  %v2391_v12 = vadd.f32 %v2390_v18, %v4913_v57  ;;  %2537 = vxpose.xlu0.b32.cont [15/16] %v2455_v49, 128 }
 0x2e8   :  { %v2392_v17 = vpop.f32.mrf.mxu0 }
 0x2e9   :  { %v2457_v23 = vmax.f32 %v2391_v12, 0.0  ;;  %v2393_v31 = vadd.f32 %v2392_v17, %v4917_v21  ;;  %2569 = vxpose.xlu1.b32.cont [15/16] %v2456_v61, 128  ;;  %v2617_v17 = vld [vmem:[%s5158_s11 + $0xf0] sm:$0xff] }
 0x2eb   :  { %v2458_v39 = vmax.f32 %v2393_v31, 0.0  ;;  %2538 = vxpose.xlu0.b32.end [16/16] %v2457_v23, 128  ;;  %v2475_v45 = vpop.trf.xlu0 }
 0x2ec   :  { %v2779_v29 = vmul.f32 %v4946_v50, %v2475_v45 }
 0x2ed   :  { %2570 = vxpose.xlu1.b32.end [16/16] %v2458_v39, 128  ;;  %v5043_v35 = vpop.trf.xlu1 }
 0x2ef   :  { %v2476_v2 = vpop.trf.xlu0 }
 0x2f0   :  { %v2781_v20 = vmul.f32 %v4937_v5, %v2476_v2 }
 0x2f1   :  { %v5047_v57 = vpop.trf.xlu1 }
 0x2f2   :  { %v2843_v13 = vadd.f32 %v2781_v20, %v2779_v29 }
 0x2f3   :  { %v2477_v60 = vpop.trf.xlu0 }
 0x2f4   :  { %v2783_v0 = vmul.f32 %v4942_v47, %v2477_v60 }
 0x2f5   :  { %v5050_v1 = vpop.trf.xlu1 }
 0x2f6   :  { %v2844_v21 = vadd.f32 %v2843_v13, %v2783_v0  ;;  %v2618_v0 = vld [vmem:[%s5158_s11 + $0xf8] sm:$0xff] }
 0x2f7   :  { %v2478_v14 = vpop.trf.xlu0 }
 0x2f8   :  { %v2785_v8 = vmul.f32 %v4949_v43, %v2478_v14 }
 0x2f9   :  { %v2510_v51 = vpop.trf.xlu1 }
 0x2fa   :  { %v2845_v46 = vadd.f32 %v2844_v21, %v2785_v8 }
 0x2fb   :  { %v2479_v30 = vpop.trf.xlu0 }
 0x2fc   :  { %v2787_v3 = vmul.f32 %v4956_v24, %v2479_v30 }
 0x2fd   :  { %v2511_v19 = vpop.trf.xlu1 }
 0x2fe   :  { %v2846_v40 = vadd.f32 %v2845_v46, %v2787_v3 }
 0x2ff   :  { %v2480_v54 = vpop.trf.xlu0 }
 0x300   :  { %v2789_v37 = vmul.f32 %v4953_v62, %v2480_v54 }
 0x301   :  { %v2512_v27 = vpop.trf.xlu1 }
 0x302   :  { %v2847_v28 = vadd.f32 %v2846_v40, %v2789_v37 }
 0x303   :  { %v2481_v38 = vpop.trf.xlu0 }
 0x304   :  { %v2791_v49 = vmul.f32 %v4963_v52, %v2481_v38 }
 0x305   :  { %v2513_v41 = vpop.trf.xlu1 }
 0x306   :  { %v2848_v18 = vadd.f32 %v2847_v28, %v2791_v49 }
 0x307   :  { %v2482_v61 = vpop.trf.xlu0 }
 0x308   :  { %v2793_v12 = vmul.f32 %v4960_v22, %v2482_v61 }
 0x309   :  { %v2514_v23 = vpop.trf.xlu1 }
 0x30a   :  { %v2849_v31 = vadd.f32 %v2848_v18, %v2793_v12 }
 0x30b   :  { %2771 = vperm.xlu1 %3173, %v2617_v17   ;;  %v2483_v39 = vpop.trf.xlu0 }
 0x30c   :  { %v2795_v45 = vmul.f32 %v4970_v4, %v2483_v39 }
 0x30d   :  { %v2515_v2 = vpop.trf.xlu1 }
 0x30e   :  { %v2850_v29 = vadd.f32 %v2849_v31, %v2795_v45 }
 0x30f   :  { %v2484_v20 = vpop.trf.xlu0 }
 0x310   :  { %v2797_v13 = vmul.f32 %v4967_v6, %v2484_v20 }
 0x311   :  { %v2516_v60 = vpop.trf.xlu1 }
 0x312   :  { %v2851_v21 = vadd.f32 %v2850_v29, %v2797_v13 }
 0x313   :  { %v2485_v14 = vpop.trf.xlu0 }
 0x314   :  { %v2799_v8 = vmul.f32 %v4977_v44, %v2485_v14  ;;  %2776 = vperm.xlu0 %3172, %v2618_v0   ;;  %v2811_v14 = vmul.f32 %v4998_v32, %v5043_v35  ;;  %v2819_v35 = vmul.f32 %v5012_v25, %v2511_v19  ;;  %v2829_v19 = vmul.f32 %v5023_v48, %v2516_v60 }
 0x315   :  { %v2517_v46 = vpop.trf.xlu1 }
 0x316   :  { %v2852_v30 = vadd.f32 %v2851_v21, %v2799_v8 }
 0x317   :  { %v2486_v3 = vpop.trf.xlu0 }
 0x318   :  { %v2801_v40 = vmul.f32 %v4974_v9, %v2486_v3  ;;  %v2813_v3 = vmul.f32 %v4995_v16, %v5047_v57 }
 0x319   :  { %v2518_v54 = vpop.trf.xlu1 }
 0x31a   :  { %v2853_v37 = vadd.f32 %v2852_v30, %v2801_v40 }
 0x31b   :  { %v2487_v28 = vpop.trf.xlu0 }
 0x31c   :  { %v2803_v38 = vmul.f32 %v4984_v36, %v2487_v28  ;;  %v2815_v28 = vmul.f32 %v5005_v55, %v5050_v1 }
 0x31d   :  { %v2519_v49 = vpop.trf.xlu1 }
 0x31e   :  { %v2854_v18 = vadd.f32 %v2853_v37, %v2803_v38 }
 0x31f   :  { %v2488_v61 = vpop.trf.xlu0 }
 0x320   :  { %v2805_v12 = vmul.f32 %v4981_v59, %v2488_v61  ;;  %v2817_v61 = vmul.f32 %v5002_v11, %v2510_v51  ;;  %v2827_v51 = vmul.f32 %v5026_v34, %v2515_v2 }
 0x321   :  { %v2520_v17 = vpop.trf.xlu1 }
 0x322   :  { %v2855_v31 = vadd.f32 %v2854_v18, %v2805_v12  ;;  %v2837_v2 = vmul.f32 %v5037_v15, %v2520_v17 }
 0x323   :  { %v2489_v39 = vpop.trf.xlu0 }
 0x324   :  { %v2807_v45 = vmul.f32 %v4991_v26, %v2489_v39 }
 0x325   :  { %v5070_v29 = vpop.trf.xlu1 }
 0x326   :  { %v2856_v20 = vadd.f32 %v2855_v31, %v2807_v45 }
 0x327   :  { %v2490_v13 = vpop.trf.xlu0 }
 0x328   :  { %v2809_v0 = vmul.f32 %v4988_v10, %v2490_v13  ;;  %v2823_v13 = vmul.f32 %v5019_v58, %v2513_v41 }
 0x329   :  { %v5073_v21 = vpop.trf.xlu1 }
 0x32a   :  { %v2857_v8 = vadd.f32 %v2856_v20, %v2809_v0  ;;  %v2821_v20 = vmul.f32 %v5009_v56, %v2512_v27  ;;  %v2831_v27 = vmul.f32 %v5033_v33, %v2517_v46 }
 0x32b   :  { %v2539_v30 = vpop.trf.xlu0 }
 0x32c   :  { %v2858_v40 = vadd.f32 %v2857_v8, %v2811_v14  ;;  %v2825_v8 = vmul.f32 %v5016_v53, %v2514_v23 }
 0x32d   :  { %v5079_v37 = vpop.trf.xlu1 }
 0x32e   :  { %v2859_v38 = vadd.f32 %v2858_v40, %v2813_v3 }
 0x32f   :  { %v2540_v18 = vpop.trf.xlu0 }
 0x330   :  { %v2860_v12 = vadd.f32 %v2859_v38, %v2815_v28 }
 0x331   :  { %v5084_v31 = vpop.trf.xlu1 }
 0x332   :  { %v2861_v39 = vadd.f32 %v2860_v12, %v2817_v61 }
 0x333   :  { %v2541_v45 = vpop.trf.xlu0 }
 0x334   :  { %v2862_v57 = vadd.f32 %v2861_v39, %v2819_v35  ;;  %v2833_v35 = vmul.f32 %v5030_v42, %v2518_v54  ;;  %v2784_v54 = vmul.f32 %v4942_v47, %v2541_v45 }
 0x335   :  { %v5089_v14 = vpop.trf.xlu1 }
 0x336   :  { %v2863_v0 = vadd.f32 %v2862_v57, %v2821_v20  ;;  %v2835_v20 = vmul.f32 %v5040_v7, %v2519_v49 }
 0x337   :  { %v2542_v1 = vpop.trf.xlu0 }
 0x338   :  { %v2864_v3 = vadd.f32 %v2863_v0, %v2823_v13  ;;  %v2786_v49 = vmul.f32 %v4949_v43, %v2542_v1 }
 0x339   :  { %v5094_v61 = vpop.trf.xlu1 }
 0x33a   :  { %v2865_v40 = vadd.f32 %v2864_v3, %v2825_v8 }
 0x33b   :  { %v2543_v28 = vpop.trf.xlu0 }
 0x33c   :  { %v2866_v38 = vadd.f32 %v2865_v40, %v2827_v51  ;;  %v2782_v51 = vmul.f32 %v4937_v5, %v2540_v18  ;;  %v2780_v40 = vmul.f32 %v4946_v50, %v2539_v30  ;;  %v2788_v17 = vmul.f32 %v4956_v24, %v2543_v28 }
 0x33d   :  { %v2575_v57 = vpop.trf.xlu1 }
 0x33e   :  { %v2867_v12 = vadd.f32 %v2866_v38, %v2829_v19  ;;  %v2880_v19 = vadd.f32 %v2782_v51, %v2780_v40 }
 0x33f   :  { %v2544_v41 = vpop.trf.xlu0 }
 0x340   :  { %v2868_v39 = vadd.f32 %v2867_v12, %v2831_v27  ;;  %v2881_v12 = vadd.f32 %v2880_v19, %v2784_v54 }
 0x341   :  { %v2576_v3 = vpop.trf.xlu1 }
 0x342   :  { %v2869_v23 = vadd.f32 %v2868_v39, %v2833_v35  ;;  %v2882_v35 = vadd.f32 %v2881_v12, %v2786_v49  ;;  %v2790_v39 = vmul.f32 %v4953_v62, %v2544_v41 }
 0x343   :  { %v2545_v13 = vpop.trf.xlu0 }
 0x344   :  { %v2870_v0 = vadd.f32 %v2869_v23, %v2835_v20  ;;  %v2883_v23 = vadd.f32 %v2882_v35, %v2788_v17  ;;  %v2792_v5 = vmul.f32 %v4963_v52, %v2545_v13 }
 0x345   :  { %v2577_v38 = vpop.trf.xlu1 }
 0x346   :  { %v5100_v8 = vadd.f32 %v2870_v0, %v2837_v2  ;;  %v2884_v2 = vadd.f32 %v2883_v23, %v2790_v39 }
 0x347   :  { %v2546_v60 = vpop.trf.xlu0 }
 0x348   :  { %v2794_v50 = vmul.f32 %v4960_v22, %v2546_v60  ;;  %v2885_v30 = vadd.f32 %v2884_v2, %v2792_v5  ;;  %v2820_v5 = vmul.f32 %v5012_v25, %v2575_v57 }
 0x349   :  { %v2578_v18 = vpop.trf.xlu1 }
 0x34a   :  { %v2886_v45 = vadd.f32 %v2885_v30, %v2794_v50  ;;  %v2824_v50 = vmul.f32 %v5019_v58, %v2577_v38 }
 0x34b   :  { %v2547_v46 = vpop.trf.xlu0 }
 0x34c   :  { %v2796_v43 = vmul.f32 %v4970_v4, %v2547_v46 }
 0x34d   :  { %v2579_v0 = vpop.trf.xlu1 }
 0x34e   :  { %v2887_v28 = vadd.f32 %v2886_v45, %v2796_v43 }
 0x34f   :  { %v2548_v27 = vpop.trf.xlu0 }
 0x350   :  { %v2798_v1 = vmul.f32 %v4967_v6, %v2548_v27 }
 0x351   :  { %v2580_v22 = vpop.trf.xlu1 }
 0x352   :  { %v2888_v41 = vadd.f32 %v2887_v28, %v2798_v1 }
 0x353   :  { %v2549_v20 = vpop.trf.xlu0 }
 0x354   :  { %v2800_v62 = vmul.f32 %v4977_v44, %v2549_v20 }
 0x355   :  { %v2581_v49 = vpop.trf.xlu1 }
 0x356   :  { %v2889_v13 = vadd.f32 %v2888_v41, %v2800_v62  ;;  %v2832_v25 = vmul.f32 %v5033_v33, %v2581_v49 }
 0x357   :  { %v2550_v47 = vpop.trf.xlu0 }
 0x358   :  { %v2802_v51 = vmul.f32 %v4974_v9, %v2550_v47  ;;  %v2812_v9 = vmul.f32 %v4998_v32, %v5079_v37  ;;  %v2822_v32 = vmul.f32 %v5009_v56, %v2576_v3 }
 0x359   :  { %v2582_v39 = vpop.trf.xlu1 }
 0x35a   :  { %v2890_v60 = vadd.f32 %v2889_v13, %v2802_v51  ;;  %v2834_v56 = vmul.f32 %v5030_v42, %v2582_v39 }
 0x35b   :  { %v2551_v24 = vpop.trf.xlu0 }
 0x35c   :  { %v2804_v40 = vmul.f32 %v4984_v36, %v2551_v24  ;;  %v2814_v36 = vmul.f32 %v4995_v16, %v5084_v31  ;;  %v2826_v31 = vmul.f32 %v5016_v53, %v2578_v18 }
 0x35d   :  { %v2583_v2 = vpop.trf.xlu1 }
 0x35e   :  { %v2891_v46 = vadd.f32 %v2890_v60, %v2804_v40  ;;  %v2836_v38 = vmul.f32 %v5040_v7, %v2583_v2 }
 0x35f   :  { %v2552_v52 = vpop.trf.xlu0 }
 0x360   :  { %v2806_v54 = vmul.f32 %v4981_v59, %v2552_v52  ;;  %v2816_v59 = vmul.f32 %v5005_v55, %v5089_v14  ;;  %v2828_v55 = vmul.f32 %v5026_v34, %v2579_v0 }
 0x361   :  { %v2584_v30 = vpop.trf.xlu1 }
 0x362   :  { %v2892_v19 = vadd.f32 %v2891_v46, %v2806_v54  ;;  %v2838_v1 = vmul.f32 %v5037_v15, %v2584_v30 }
 0x363   :  { %v2553_v4 = vpop.trf.xlu0 }
 0x364   :  { %v2808_v6 = vmul.f32 %v4991_v26, %v2553_v4  ;;  %v2818_v26 = vmul.f32 %v5002_v11, %v5094_v61  ;;  %v2830_v11 = vmul.f32 %v5023_v48, %v2580_v22  ;;  %v3352_v22 = vmov 1966171168  }
 0x365   :  { %v2585_v43 = vpop.trf.xlu1  ;;  %v2922_v60 = vunpack.c.l.s4 %v3352_v22 }
 0x366   :  { %v2893_v12 = vadd.f32 %v2892_v19, %v2808_v6 }
 0x367   :  { %v2554_v27 = vpop.trf.xlu0  ;;  %v2923_v46 = vunpack.c.0.s8 %v2922_v60 }
 0x368   :  { %v2810_v44 = vmul.f32 %v4988_v10, %v2554_v27 }
 0x369   :  { %v2586_v3 = vpop.trf.xlu1 }
 0x36a   :  { %v2894_v17 = vadd.f32 %v2893_v12, %v2810_v44  ;;  %v2917_v44 = vld [vmem:[%s5150_s3] sm:$0x3] }
 0x36c   :  { %v2895_v35 = vadd.f32 %v2894_v17, %v2812_v9  ;;  %v5340_v17 = vlaneseq }
 0x36e   :  { %v2896_v20 = vadd.f32 %v2895_v35, %v2814_v36  ;;  %vm2939_vm3 = vcmp.lt.s32.totalorder %v5340_v17, 256 }
 0x370   :  { %v2897_v23 = vadd.f32 %v2896_v20, %v2816_v59 }
 0x372   :  { %v2898_v10 = vadd.f32 %v2897_v23, %v2818_v26 }
 0x374   :  { %v2899_v37 = vadd.f32 %v2898_v10, %v2820_v5 }
 0x376   :  { %v2900_v16 = vadd.f32 %v2899_v37, %v2822_v32 }
 0x378   :  { %v2901_v47 = vadd.f32 %v2900_v16, %v2824_v50 }
 0x37a   :  { %v2902_v14 = vadd.f32 %v2901_v47, %v2826_v31 }
 0x37c   :  { %v2903_v61 = vadd.f32 %v2902_v14, %v2828_v55 }
 0x37e   :  { %v2904_v57 = vadd.f32 %v2903_v61, %v2830_v11 }
 0x380   :  { %v2905_v45 = vadd.f32 %v2904_v57, %v2832_v25 }
 0x382   :  { %v2906_v58 = vadd.f32 %v2905_v45, %v2834_v56 }
 0x384   :  { %v2907_v53 = vadd.f32 %v2906_v58, %v2836_v38 }
 0x386   :  { %v2772_v18 = vpop.permute.xlu1 %2771  ;;  %v2908_v48 = vadd.f32 %v2907_v53, %v2838_v1 }
 0x387   :  { %v2839_v34 = vmul.f32 %v2772_v18, %v5070_v29  ;;  %v2840_v0 = vmul.f32 %v2772_v18, %v2585_v43 }
 0x389   :  { %v2872_v28 = vadd.f32 %v5100_v8, %v2839_v34  ;;  %v2909_v33 = vadd.f32 %v2908_v48, %v2840_v0 }
 0x38f   :  { %v2777_v24 = vpop.permute.xlu0 %2776 }
 0x390   :  { %v2841_v62 = vmul.f32 %v2777_v24, %v5073_v21  ;;  %v2842_v41 = vmul.f32 %v2777_v24, %v2586_v3  ;;  %v2926_v21 = vsub.s32 %v2923_v46, %v4604_v63 }
 0x392   :  { %v2873_v42 = vadd.f32 %v2872_v28, %v2841_v62  ;;  %v2910_v51 = vadd.f32 %v2909_v33, %v2842_v41 }
 0x394   :  { %v2874_v52 = vrot.slane %v2873_v42, 4  ;;  %v2911_v13 = vrot.slane %v2910_v51, 4 }
 0x396   :  { %v2875_v7 = vadd.f32 %v2874_v52, %v2873_v42  ;;  %v2912_v40 = vadd.f32 %v2911_v13, %v2910_v51 }
 0x398   :  { %v2876_v15 = vrot.slane %v2875_v7, 2  ;;  %v2913_v54 = vrot.slane %v2912_v40, 2 }
 0x39a   :  { %v2877_v29 = vadd.f32 %v2876_v15, %v2875_v7  ;;  %v2914_v4 = vadd.f32 %v2913_v54, %v2912_v40 }
 0x39c   :  { %v2878_v6 = vrot.slane %v2877_v29, 1  ;;  %v2915_v19 = vrot.slane %v2914_v4, 1 }
 0x39e   :  { %v2879_v8 = vadd.f32 %v2878_v6, %v2877_v29  ;;  %v2916_v49 = vadd.f32 %v2915_v19, %v2914_v4 }
 0x3a0   :  { %v2920_v27 = vcombine.low %v2879_v8, %v2916_v49 }
 0x3a2   :  { %v2927_v12 = vrot.slane %v2920_v27, %v2926_v21 }
 0x3a4   :  { %v2934_v9 = vrot.slane %v2927_v12, %v2926_v21 }
 0x3a6   :  { %v2936_v36 = vadd.f32 %v2934_v9, %v2917_v44 }
 0x3a8   :  { %2941 = vst.msk [vmem:[#allocation2] sm:$0x3] %vm2939_vm3, %v2936_v36 }
 0x3a9   :  { %3340 = shalt.err (!%p3337_p4)
}
 0x3aa   :  { %2951 = dma.vmem_to_hbm [thread:$0]  %s2949_s9, 32, %s5159_s12, [#allocation3]  }
 0x3ab   :  { %3349 = dma.done.wait [#allocation3], 32  }
 0x3ac   :  { %3350 = vsyncadd [#allocation3], 4294967264 }
 0x3ad   :  { %2955 = vsyncpa [#allocation3], 1 }

</bundles_post_ra>
